<compile_context>
chip_gen: v7x
topology: tpu7x:2x2x1
jax: 0.10.0
libtpu: 0.0.40
codegen_flags: <defaults>
</compile_context>

<pallas_src>
import math
import functools

import jax
import jax.numpy as jnp
from jax.experimental import pallas as pl
from jax.experimental.pallas import tpu as pltpu


# Row layout of the packed per-layer (12, D) bias / LayerNorm tensor.
ROW_SA_B = 0      # fused self-attn bias        (b_v @ W_out + b_out)
ROW_CAQ_B = 1     # cross-attn Q bias           (scale folded in)
ROW_K_B = 2       # cross-attn K bias
ROW_V_B = 3       # cross-attn V bias
ROW_CAO_B = 4     # cross-attn out-proj bias
ROW_FF2_B = 5     # FFN second linear bias
ROW_LN1_W, ROW_LN1_B = 6, 7
ROW_LN2_W, ROW_LN2_B = 8, 9
ROW_LN3_W, ROW_LN3_B = 10, 11
N_VEC_ROWS = 12


def _layernorm(x, w, b, eps=1e-5):
    # Matches PyTorch LayerNorm: biased variance, eps inside rsqrt.
    mu = jnp.mean(x, axis=-1, keepdims=True)
    var = jnp.mean((x - mu) ** 2, axis=-1, keepdims=True)
    return (x - mu) * jax.lax.rsqrt(var + eps) * w + b


def _decoder_layer_kernel(n_heads,
                          x_ref, cls_ref, seg_ref, segt_ref, fc_w_ref, fc_b_ref,
                          sa_w, ca_q_w, ca_kv_w, ca_out_w, ff1_w, ff2_w,
                          vecs, ff1_b,
                          out_ref, tgt_ref):
    """One decoder layer per grid step; tgt carried in VMEM scratch."""
    layer = pl.program_id(1)
    n_layers = pl.num_programs(1)

    Bb, S, D = x_ref.shape
    cdt = sa_w.dtype                          # bf16 MXU operand dtype

    # ---- init carried target (CLS token broadcast over the batch block) ----
    @pl.when(layer == 0)
    def _init():
        tgt_ref[...] = jnp.broadcast_to(cls_ref[...].astype(jnp.float32),
                                        tgt_ref.shape)

    tgt = tgt_ref[...]                        # (Bb, D) f32

    # ---- self-attention block ----------------------------------------------
    # Target length == 1 (the CLS token): softmax over a single key is exactly
    # 1, so SelfAttn(tgt) == tgt @ (Wv @ Wout) + b_fused.  The fused weight is
    # composed on the host; self-attn Q/K weights are unused (exact shortcut
    # only for a length-1 target).
    sa = (jnp.dot(tgt.astype(cdt), sa_w[...],
                  preferred_element_type=jnp.float32)
          + vecs[ROW_SA_B:ROW_SA_B + 1, :])
    tgt = _layernorm(tgt + sa,
                     vecs[ROW_LN1_W:ROW_LN1_W + 1, :],
                     vecs[ROW_LN1_B:ROW_LN1_B + 1, :])

    # ---- cross-attention block (query = CLS, key/value = memory) ------------
    mem2d = x_ref[...].reshape(Bb * S, D)                       # bf16 (B*S, D)
    q = (jnp.dot(tgt.astype(cdt), ca_q_w[...],
                 preferred_element_type=jnp.float32)
         + vecs[ROW_CAQ_B:ROW_CAQ_B + 1, :])                    # (Bb, D), pre-scaled
    # fused K|V projection: one (B*S, D) x (D, 2D) matmul, f32 accumulation
    kv = jnp.dot(mem2d, ca_kv_w[...],
                 preferred_element_type=jnp.float32)            # (B*S, 2D)
    k = (kv[:, :D] + vecs[ROW_K_B:ROW_K_B + 1, :]).astype(cdt).reshape(Bb, S, D)
    v = (kv[:, D:] + vecs[ROW_V_B:ROW_V_B + 1, :]).astype(cdt).reshape(Bb, S, D)

    # per-head scores via a single contraction with the 0/1 head-segment
    # matrix seg (D, H):  s[b,s,h] = sum_{d in head h} q[b,d] * k[b,s,d]
    e = q.astype(cdt)[:, None, :] * k                           # (Bb, S, D) bf16
    s = jnp.dot(e.reshape(Bb * S, D), seg_ref[...],
                preferred_element_type=jnp.float32).reshape(Bb, S, n_heads)
    s = s - jnp.max(s, axis=1, keepdims=True)
    p = jnp.exp(s)
    p = p * pl.reciprocal(jnp.sum(p, axis=1, keepdims=True), approx=True)
    # broadcast per-head probs back onto D lanes and reduce over keys
    p_full = jnp.dot(p.astype(cdt).reshape(Bb * S, n_heads), segt_ref[...],
                     preferred_element_type=jnp.float32).reshape(Bb, S, D)
    attn = jnp.sum(p_full * v.astype(jnp.float32), axis=1)      # (Bb, D) f32
    ca = (jnp.dot(attn.astype(cdt), ca_out_w[...],
                  preferred_element_type=jnp.float32)
          + vecs[ROW_CAO_B:ROW_CAO_B + 1, :])
    tgt = _layernorm(tgt + ca,
                     vecs[ROW_LN2_W:ROW_LN2_W + 1, :],
                     vecs[ROW_LN2_B:ROW_LN2_B + 1, :])

    # ---- feed-forward block (dim_feedforward = 4 * d_model, relu) -----------
    h1 = jnp.dot(tgt.astype(cdt), ff1_w[...],
                 preferred_element_type=jnp.float32) + ff1_b[...]
    h1 = jnp.maximum(h1, 0.0)
    ff = (jnp.dot(h1.astype(cdt), ff2_w[...],
                  preferred_element_type=jnp.float32)
          + vecs[ROW_FF2_B:ROW_FF2_B + 1, :])
    tgt = _layernorm(tgt + ff,
                     vecs[ROW_LN3_W:ROW_LN3_W + 1, :],
                     vecs[ROW_LN3_B:ROW_LN3_B + 1, :])

    tgt_ref[...] = tgt

    # ---- classifier head (last layer only), lane-dense output slab ----------
    @pl.when(layer == n_layers - 1)
    def _final():
        logits = jnp.sum(tgt * fc_w_ref[...], axis=-1, keepdims=True) + fc_b_ref[...]
        out_ref[...] = jnp.broadcast_to(logits, out_ref.shape)


def _vmem_budget_bytes(B_blk, S, D):
    """Rough per-call VMEM footprint for the chosen block shapes."""
    bf, f32 = 2, 4
    weights = 13 * D * D * bf * 2                     # double-buffered bf16 weights
    biases = (N_VEC_ROWS * D + 4 * D) * f32 * 2       # packed vecs + ff1_b
    xblk = B_blk * S * D * bf * 2                     # memory block, double-buffered
    consts = (2 * D + 2 * D * 8 + 2) * f32            # cls/fc/seg/segt (generous)
    scratch = B_blk * D * f32                         # carried tgt
    outblk = B_blk * 128 * f32 * 2
    temps = (B_blk * S * (2 * D * f32 + 3 * D * bf + D * f32)   # kv, k/v/e, p_full
             + B_blk * 4 * D * f32 * 2)                          # h1 + slack
    return weights + biases + xblk + consts + scratch + outblk + temps


def transformer_binary_classifier(x, params, *, seq_len, d_model, n_heads,
                                  n_layers):
    """Forward pass. x: (B, seq_len*d_model) or anything viewable to (B,S,D)."""
    B = x.shape[0]
    D = d_model
    S = seq_len
    x = x.reshape(B, S, D)

    # pad batch to a sublane multiple (>=8); keep one batch block up to 256
    # rows so per-layer weights are streamed exactly once (nb == 1) and the
    # 256x256 MXU is filled on v6e/v7x.  Padded rows are sliced off below.
    B_pad = -(-B // 8) * 8
    if B_pad <= 256:
        B_blk, nb = B_pad, 1
    else:
        B_blk = 256
        B_pad = -(-B_pad // B_blk) * B_blk
        nb = B_pad // B_blk
    if B_pad != B:
        x = jnp.pad(x, ((0, B_pad - B), (0, 0), (0, 0)))
    x = x.astype(jnp.bfloat16)                # memory is a matmul operand only

    hd = D // n_heads
    # 0/1 head-segment matrix (D, H) and its transpose, bf16 (exactly
    # representable) so both segment contractions are single-pass bf16 MXU ops.
    seg = (jnp.arange(D)[:, None] // hd
           == jnp.arange(n_heads)[None, :]).astype(jnp.bfloat16)
    seg_t = jnp.transpose(seg)

    def full_spec(shape):
        return pl.BlockSpec(shape, lambda b, l: (0,) * len(shape))

    def layer_spec(shape):
        # stacked (L, *shape) parameter, streamed one layer at a time
        return pl.BlockSpec((None,) + tuple(shape),
                            lambda b, l: (l,) + (0,) * len(shape))

    in_specs = [
        pl.BlockSpec((B_blk, S, D), lambda b, l: (b, 0, 0)),    # x (memory)
        full_spec((1, D)),                                      # cls
        full_spec((D, n_heads)),                                # seg
        full_spec((n_heads, D)),                                # seg_t
        full_spec((1, D)),                                      # fc_w
        full_spec((1, 1)),                                      # fc_b
        layer_spec((D, D)),                                     # sa_w (fused)
        layer_spec((D, D)),                                     # ca_q_w (scaled)
        layer_spec((D, 2 * D)),                                 # ca_kv_w
        layer_spec((D, D)),                                     # ca_out_w
        layer_spec((D, 4 * D)),                                 # ff1_w
        layer_spec((4 * D, D)),                                 # ff2_w
        layer_spec((N_VEC_ROWS, D)),                            # packed biases/LN
        layer_spec((1, 4 * D)),                                 # ff1_b
    ]

    inputs = [
        x, params["cls"], seg, seg_t, params["fc_w"], params["fc_b"],
        params["sa_w"], params["ca_q_w"], params["ca_kv_w"], params["ca_out_w"],
        params["ff1_w"], params["ff2_w"],
        params["vecs"], params["ff1_b"],
    ]

    # VMEM limit from actual block shapes, clamped to the chip's capacity.
    budget = _vmem_budget_bytes(B_blk, S, D)
    try:
        vmem_cap = int(pltpu.get_tpu_info().vmem_capacity_bytes)
    except Exception:
        vmem_cap = 64 * 1024 * 1024
    vmem_limit = int(min(max(1.5 * budget, 32 * 1024 * 1024), 0.8 * vmem_cap))

    out = pl.pallas_call(
        functools.partial(_decoder_layer_kernel, n_heads),
        out_shape=jax.ShapeDtypeStruct((B_pad, 128), jnp.float32),
        grid=(nb, n_layers),
        in_specs=in_specs,
        out_specs=pl.BlockSpec((B_blk, 128), lambda b, l: (b, 0)),
        scratch_shapes=[pltpu.VMEM((B_blk, D), jnp.float32)],   # carried tgt
        compiler_params=pltpu.CompilerParams(
            dimension_semantics=("parallel", "arbitrary"),
            vmem_limit_bytes=vmem_limit),
    )(*inputs)
    return out[:B, 0]                         # logits.squeeze(1) -> (B,)


def init_params(key, d_model, n_heads, n_layers):
    """Deterministic synthetic parameters, already in kernel layout.

    Mapping from a real torch checkpoint:
      * matmul weights are pre-transposed to (D_in, D_out):  W_kernel = W_torch.T
      * self-attn V/out projections fused:  sa_w = Wv.T @ Wout.T  (f32 compose,
        then bf16),  sa_b = b_v @ Wout.T + b_out
      * cross-attn K and V projections fused into one (D, 2D) weight
      * 1/sqrt(head_dim) folded into ca_q_w / ca_q_b
      * all (1, D)-shaped bias / LayerNorm vectors packed into vecs (L, 12, D)
      * self-attn Q/K weights omitted (unused for a length-1 target)
      * dropout layers are identity at inference time; no params needed.
    """
    D, L = d_model, n_layers
    hd = D // n_heads
    scale = 1.0 / math.sqrt(hd)
    f32, bf16 = jnp.float32, jnp.bfloat16
    ks = jax.random.split(key, 16)

    def w(k, shape, s=0.02):
        return (s * jax.random.normal(k, shape)).astype(f32)

    def b(k, shape, s=0.01):
        return (s * jax.random.normal(k, shape)).astype(f32)

    # raw (torch-transposed) weights, f32
    sa_v_w, sa_v_b = w(ks[1], (L, D, D)), b(ks[2], (L, D))
    sa_out_w, sa_out_b = w(ks[3], (L, D, D)), b(ks[4], (L, D))
    ca_q_w, ca_q_b = w(ks[5], (L, D, D)), b(ks[6], (L, D))
    ca_kv_w, ca_kv_b = w(ks[7], (L, D, 2 * D)), b(ks[8], (L, 2 * D))
    ca_out_w, ca_out_b = w(ks[9], (L, D, D)), b(ks[10], (L, D))
    ff1_w, ff1_b = w(ks[11], (L, D, 4 * D)), b(ks[12], (L, 4 * D))
    ff2_w, ff2_b = w(ks[13], (L, 4 * D, D)), b(ks[14], (L, D))
    ln_w = jnp.ones((L, D), f32)
    ln_b = jnp.zeros((L, D), f32)

    # host-side fusions (all in f32, cast to bf16 at the end)
    sa_w = jnp.einsum("lij,ljk->lik", sa_v_w, sa_out_w)
    sa_b = jnp.einsum("lj,ljk->lk", sa_v_b, sa_out_w) + sa_out_b
    ca_q_w_s = ca_q_w * scale
    ca_q_b_s = ca_q_b * scale

    vecs = jnp.stack(
        [sa_b, ca_q_b_s,
         ca_kv_b[:, :D], ca_kv_b[:, D:],
         ca_out_b, ff2_b,
         ln_w, ln_b, ln_w, ln_b, ln_w, ln_b],
        axis=1)                               # (L, 12, D) f32

    return dict(
        cls=jax.random.normal(ks[0], (1, D), dtype=f32),   # torch randn(1,1,D)
        sa_w=sa_w.astype(bf16),
        ca_q_w=ca_q_w_s.astype(bf16),
        ca_kv_w=ca_kv_w.astype(bf16),
        ca_out_w=ca_out_w.astype(bf16),
        ff1_w=ff1_w.astype(bf16),
        ff2_w=ff2_w.astype(bf16),
        vecs=vecs,
        ff1_b=ff1_b.reshape(L, 1, 4 * D),
        fc_w=w(ks[15], (1, D)),                             # Linear(D, 1)
        fc_b=jnp.zeros((1, 1), f32),
    )


if __name__ == "__main__":
    d_model, seq_len, n_heads, n_layers = 32, 8, 4, 2
    batch = 2

    key = jax.random.PRNGKey(0)
    k_x, k_p = jax.random.split(key)
    x = jax.random.normal(k_x, (batch, seq_len, d_model), dtype=jnp.float32)
    params = init_params(k_p, d_model, n_heads, n_layers)

    logits = transformer_binary_classifier(
        x, params, seq_len=seq_len, d_model=d_model,
        n_heads=n_heads, n_layers=n_layers)
    logits = jax.block_until_ready(logits)
    assert logits.shape == (batch,)
    assert bool(jnp.all(jnp.isfinite(logits)))
    print("KERNEL_OK")
</pallas_src>

<mosaic_0001>
module attributes {stable_mosaic.version = 11 : i64} {
  func.func @_decoder_layer_kernel(%arg0: i32, %arg1: i32, %arg2: memref<8x8x32xbf16, #tpu.memory_space<vmem>>, %arg3: memref<1x32xf32, #tpu.memory_space<vmem>>, %arg4: memref<32x4xbf16, #tpu.memory_space<vmem>>, %arg5: memref<4x32xbf16, #tpu.memory_space<vmem>>, %arg6: memref<1x32xf32, #tpu.memory_space<vmem>>, %arg7: memref<1x1xf32, #tpu.memory_space<vmem>>, %arg8: memref<1x32x32xbf16, #tpu.memory_space<vmem>>, %arg9: memref<1x32x32xbf16, #tpu.memory_space<vmem>>, %arg10: memref<1x32x64xbf16, #tpu.memory_space<vmem>>, %arg11: memref<1x32x32xbf16, #tpu.memory_space<vmem>>, %arg12: memref<1x32x128xbf16, #tpu.memory_space<vmem>>, %arg13: memref<1x128x32xbf16, #tpu.memory_space<vmem>>, %arg14: memref<1x12x32xf32, #tpu.memory_space<vmem>>, %arg15: memref<1x1x128xf32, #tpu.memory_space<vmem>>, %arg16: memref<8x128xf32, #tpu.memory_space<vmem>>, %arg17: memref<8x32xf32, #tpu.memory_space<vmem>>) attributes {dimension_semantics = [#tpu.dimension_semantics<parallel>, #tpu.dimension_semantics<arbitrary>], iteration_bounds = array<i64: 1, 2>, scalar_prefetch = 0 : i64, scratch_operands = 1 : i64, tpu.core_type = #tpu.core_type<tc>, window_params = [{transform_indices = @transform_0, window_bounds = array<i64: 8, 8, 32>}, {pipeline_mode = #tpu.pipeline_mode<synchronous>, transform_indices = @transform_1, window_bounds = array<i64: 1, 32>}, {pipeline_mode = #tpu.pipeline_mode<synchronous>, transform_indices = @transform_2, window_bounds = array<i64: 32, 4>}, {pipeline_mode = #tpu.pipeline_mode<synchronous>, transform_indices = @transform_3, window_bounds = array<i64: 4, 32>}, {pipeline_mode = #tpu.pipeline_mode<synchronous>, transform_indices = @transform_4, window_bounds = array<i64: 1, 32>}, {pipeline_mode = #tpu.pipeline_mode<synchronous>, transform_indices = @transform_5, window_bounds = array<i64: 1, 1>}, {transform_indices = @transform_6, window_bounds = array<i64: 1, 32, 32>}, {transform_indices = @transform_7, window_bounds = array<i64: 1, 32, 32>}, {transform_indices = @transform_8, window_bounds = array<i64: 1, 32, 64>}, {transform_indices = @transform_9, window_bounds = array<i64: 1, 32, 32>}, {transform_indices = @transform_10, window_bounds = array<i64: 1, 32, 128>}, {transform_indices = @transform_11, window_bounds = array<i64: 1, 128, 32>}, {transform_indices = @transform_12, window_bounds = array<i64: 1, 12, 32>}, {transform_indices = @transform_13, window_bounds = array<i64: 1, 1, 128>}, {transform_indices = @transform_14, window_bounds = array<i64: 8, 128>}]} {
    %c0_i32 = arith.constant 0 : i32
    %0 = arith.cmpi eq, %arg1, %c0_i32 : i32
    %1 = arith.extui %0 : i1 to i32
    %c0_i32_0 = arith.constant 0 : i32
    %2 = arith.cmpi ne, %1, %c0_i32_0 : i32
    scf.if %2 {
      %c0_84 = arith.constant 0 : index
      %c0_85 = arith.constant 0 : index
      %176 = vector.load %arg3[%c0_84, %c0_85] : memref<1x32xf32, #tpu.memory_space<vmem>>, vector<1x32xf32>
      %177 = vector.shape_cast %176 : vector<1x32xf32> to vector<1x32xf32>
      %178 = vector.broadcast %177 : vector<1x32xf32> to vector<8x32xf32>
      %c0_86 = arith.constant 0 : index
      %c0_87 = arith.constant 0 : index
      %179 = vector.load %arg17[%c0_86, %c0_87] : memref<8x32xf32, #tpu.memory_space<vmem>>, vector<8x32xf32>
      tpu.vector_store %arg17[%c0_86, %c0_87], %178 {strides = array<i32>} : memref<8x32xf32, #tpu.memory_space<vmem>>, vector<8x32xf32>,
    } else {
    }
    %c0 = arith.constant 0 : index
    %c0_1 = arith.constant 0 : index
    %3 = vector.load %arg17[%c0, %c0_1] : memref<8x32xf32, #tpu.memory_space<vmem>>, vector<8x32xf32>
    %4 = arith.truncf %3 : vector<8x32xf32> to vector<8x32xbf16>
    %c0_2 = arith.constant 0 : index
    %c0_3 = arith.constant 0 : index
    %c0_4 = arith.constant 0 : index
    %5 = vector.load %arg8[%c0_2, %c0_3, %c0_4] : memref<1x32x32xbf16, #tpu.memory_space<vmem>>, vector<1x32x32xbf16>
    %6 = vector.shape_cast %5 : vector<1x32x32xbf16> to vector<32x32xbf16>
    %cst = arith.constant dense<0.000000e+00> : vector<8x32xf32>
    %7 = tpu.matmul %4, %6, %cst {dimension_numbers = #tpu.dot_dimension_numbers<[1], [0], [0], [1], [0, 0, 1, 1], [], []>} : vector<8x32xbf16>, vector<32x32xbf16>, vector<8x32xf32> -> vector<8x32xf32>
    %c0_5 = arith.constant 0 : index
    %c0_6 = arith.constant 0 : index
    %c0_7 = arith.constant 0 : index
    %8 = vector.load %arg14[%c0_5, %c0_6, %c0_7] : memref<1x12x32xf32, #tpu.memory_space<vmem>>, vector<1x1x32xf32>
    %9 = vector.shape_cast %8 : vector<1x1x32xf32> to vector<1x32xf32>
    %10 = vector.broadcast %9 : vector<1x32xf32> to vector<8x32xf32>
    %11 = arith.addf %7, %10 : vector<8x32xf32>
    %12 = arith.addf %3, %11 : vector<8x32xf32>
    %c0_8 = arith.constant 0 : index
    %c6 = arith.constant 6 : index
    %c0_9 = arith.constant 0 : index
    %13 = vector.load %arg14[%c0_8, %c6, %c0_9] : memref<1x12x32xf32, #tpu.memory_space<vmem>>, vector<1x1x32xf32>
    %14 = vector.shape_cast %13 : vector<1x1x32xf32> to vector<1x32xf32>
    %c0_10 = arith.constant 0 : index
    %c7 = arith.constant 7 : index
    %c0_11 = arith.constant 0 : index
    %15 = vector.load %arg14[%c0_10, %c7, %c0_11] : memref<1x12x32xf32, #tpu.memory_space<vmem>>, vector<1x1x32xf32>
    %16 = vector.shape_cast %15 : vector<1x1x32xf32> to vector<1x32xf32>
    %cst_12 = arith.constant dense<0.000000e+00> : vector<8xf32>
    %17 = vector.multi_reduction <add>, %12, %cst_12 [1] : vector<8x32xf32> to vector<8xf32>
    %18 = vector.shape_cast %17 : vector<8xf32> to vector<8x1xf32>
    %cst_13 = arith.constant 3.200000e+01 : f32
    %19 = vector.broadcast %cst_13 : f32 to vector<8x1xf32>
    %20 = arith.divf %18, %19 : vector<8x1xf32>
    %21 = vector.broadcast %20 : vector<8x1xf32> to vector<8x32xf32>
    %22 = arith.subf %12, %21 : vector<8x32xf32>
    %23 = arith.mulf %22, %22 : vector<8x32xf32>
    %cst_14 = arith.constant dense<0.000000e+00> : vector<8xf32>
    %24 = vector.multi_reduction <add>, %23, %cst_14 [1] : vector<8x32xf32> to vector<8xf32>
    %25 = vector.shape_cast %24 : vector<8xf32> to vector<8x1xf32>
    %cst_15 = arith.constant 3.200000e+01 : f32
    %26 = vector.broadcast %cst_15 : f32 to vector<8x1xf32>
    %27 = arith.divf %25, %26 : vector<8x1xf32>
    %28 = vector.broadcast %20 : vector<8x1xf32> to vector<8x32xf32>
    %29 = arith.subf %12, %28 : vector<8x32xf32>
    %cst_16 = arith.constant 9.99999974E-6 : f32
    %30 = vector.broadcast %cst_16 : f32 to vector<8x1xf32>
    %31 = arith.addf %27, %30 : vector<8x1xf32>
    %32 = math.rsqrt %31 : vector<8x1xf32>
    %33 = vector.broadcast %32 : vector<8x1xf32> to vector<8x32xf32>
    %34 = arith.mulf %29, %33 : vector<8x32xf32>
    %35 = vector.broadcast %14 : vector<1x32xf32> to vector<8x32xf32>
    %36 = arith.mulf %34, %35 : vector<8x32xf32>
    %37 = vector.broadcast %16 : vector<1x32xf32> to vector<8x32xf32>
    %38 = arith.addf %36, %37 : vector<8x32xf32>
    %c0_17 = arith.constant 0 : index
    %c0_18 = arith.constant 0 : index
    %c0_19 = arith.constant 0 : index
    %39 = vector.load %arg2[%c0_17, %c0_18, %c0_19] : memref<8x8x32xbf16, #tpu.memory_space<vmem>>, vector<8x8x32xbf16>
    %40 = vector.shape_cast %39 : vector<8x8x32xbf16> to vector<64x32xbf16>
    %41 = arith.truncf %38 : vector<8x32xf32> to vector<8x32xbf16>
    %c0_20 = arith.constant 0 : index
    %c0_21 = arith.constant 0 : index
    %c0_22 = arith.constant 0 : index
    %42 = vector.load %arg9[%c0_20, %c0_21, %c0_22] : memref<1x32x32xbf16, #tpu.memory_space<vmem>>, vector<1x32x32xbf16>
    %43 = vector.shape_cast %42 : vector<1x32x32xbf16> to vector<32x32xbf16>
    %cst_23 = arith.constant dense<0.000000e+00> : vector<8x32xf32>
    %44 = tpu.matmul %41, %43, %cst_23 {dimension_numbers = #tpu.dot_dimension_numbers<[1], [0], [0], [1], [0, 0, 1, 1], [], []>} : vector<8x32xbf16>, vector<32x32xbf16>, vector<8x32xf32> -> vector<8x32xf32>
    %c0_24 = arith.constant 0 : index
    %c1 = arith.constant 1 : index
    %c0_25 = arith.constant 0 : index
    %45 = vector.load %arg14[%c0_24, %c1, %c0_25] : memref<1x12x32xf32, #tpu.memory_space<vmem>>, vector<1x1x32xf32>
    %46 = vector.shape_cast %45 : vector<1x1x32xf32> to vector<1x32xf32>
    %47 = vector.broadcast %46 : vector<1x32xf32> to vector<8x32xf32>
    %48 = arith.addf %44, %47 : vector<8x32xf32>
    %c0_26 = arith.constant 0 : index
    %c0_27 = arith.constant 0 : index
    %c0_28 = arith.constant 0 : index
    %49 = vector.load %arg10[%c0_26, %c0_27, %c0_28] : memref<1x32x64xbf16, #tpu.memory_space<vmem>>, vector<1x32x64xbf16>
    %50 = vector.shape_cast %49 : vector<1x32x64xbf16> to vector<32x64xbf16>
    %cst_29 = arith.constant dense<0.000000e+00> : vector<64x64xf32>
    %51 = tpu.matmul %40, %50, %cst_29 {dimension_numbers = #tpu.dot_dimension_numbers<[1], [0], [0], [1], [0, 0, 1, 1], [], []>} : vector<64x32xbf16>, vector<32x64xbf16>, vector<64x64xf32> -> vector<64x64xf32>
    %52 = vector.extract_strided_slice %51 {offsets = [0, 0], sizes = [64, 32], strides = [1, 1]} : vector<64x64xf32> to vector<64x32xf32>
    %c0_30 = arith.constant 0 : index
    %c2 = arith.constant 2 : index
    %c0_31 = arith.constant 0 : index
    %53 = vector.load %arg14[%c0_30, %c2, %c0_31] : memref<1x12x32xf32, #tpu.memory_space<vmem>>, vector<1x1x32xf32>
    %54 = vector.shape_cast %53 : vector<1x1x32xf32> to vector<1x32xf32>
    %55 = vector.broadcast %54 : vector<1x32xf32> to vector<64x32xf32>
    %56 = arith.addf %52, %55 : vector<64x32xf32>
    %57 = arith.truncf %56 : vector<64x32xf32> to vector<64x32xbf16>
    %58 = vector.shape_cast %57 : vector<64x32xbf16> to vector<8x8x32xbf16>
    %59 = vector.extract_strided_slice %51 {offsets = [0, 32], sizes = [64, 32], strides = [1, 1]} : vector<64x64xf32> to vector<64x32xf32>
    %c0_32 = arith.constant 0 : index
    %c3 = arith.constant 3 : index
    %c0_33 = arith.constant 0 : index
    %60 = vector.load %arg14[%c0_32, %c3, %c0_33] : memref<1x12x32xf32, #tpu.memory_space<vmem>>, vector<1x1x32xf32>
    %61 = vector.shape_cast %60 : vector<1x1x32xf32> to vector<1x32xf32>
    %62 = vector.broadcast %61 : vector<1x32xf32> to vector<64x32xf32>
    %63 = arith.addf %59, %62 : vector<64x32xf32>
    %64 = arith.truncf %63 : vector<64x32xf32> to vector<64x32xbf16>
    %65 = vector.shape_cast %64 : vector<64x32xbf16> to vector<8x8x32xbf16>
    %66 = arith.truncf %48 : vector<8x32xf32> to vector<8x32xbf16>
    %67 = vector.shape_cast %66 : vector<8x32xbf16> to vector<8x1x32xbf16>
    %68 = vector.broadcast %67 : vector<8x1x32xbf16> to vector<8x8x32xbf16>
    %69 = arith.mulf %68, %58 : vector<8x8x32xbf16>
    %70 = vector.shape_cast %69 : vector<8x8x32xbf16> to vector<64x32xbf16>
    %c0_34 = arith.constant 0 : index
    %c0_35 = arith.constant 0 : index
    %71 = vector.load %arg4[%c0_34, %c0_35] : memref<32x4xbf16, #tpu.memory_space<vmem>>, vector<32x4xbf16>
    %cst_36 = arith.constant dense<0.000000e+00> : vector<64x4xf32>
    %72 = tpu.matmul %70, %71, %cst_36 {dimension_numbers = #tpu.dot_dimension_numbers<[1], [0], [0], [1], [0, 0, 1, 1], [], []>} : vector<64x32xbf16>, vector<32x4xbf16>, vector<64x4xf32> -> vector<64x4xf32>
    %73 = vector.shape_cast %72 : vector<64x4xf32> to vector<8x8x4xf32>
    %cst_37 = arith.constant dense<0xFF800000> : vector<8x4xf32>
    %74 = vector.multi_reduction <maximumf>, %73, %cst_37 [1] : vector<8x8x4xf32> to vector<8x4xf32>
    %75 = vector.shape_cast %74 : vector<8x4xf32> to vector<8x1x4xf32>
    %76 = vector.broadcast %75 : vector<8x1x4xf32> to vector<8x8x4xf32>
    %77 = arith.subf %73, %76 : vector<8x8x4xf32>
    %78 = math.exp %77 : vector<8x8x4xf32>
    %cst_38 = arith.constant dense<0.000000e+00> : vector<8x4xf32>
    %79 = vector.multi_reduction <add>, %78, %cst_38 [1] : vector<8x8x4xf32> to vector<8x4xf32>
    %80 = vector.shape_cast %79 : vector<8x4xf32> to vector<8x1x4xf32>
    %81 = tpu.reciprocal %80 {approx = true} : vector<8x1x4xf32> -> vector<8x1x4xf32>
    %82 = vector.broadcast %81 : vector<8x1x4xf32> to vector<8x8x4xf32>
    %83 = arith.mulf %78, %82 : vector<8x8x4xf32>
    %84 = arith.truncf %83 : vector<8x8x4xf32> to vector<8x8x4xbf16>
    %85 = vector.shape_cast %84 : vector<8x8x4xbf16> to vector<64x4xbf16>
    %c0_39 = arith.constant 0 : index
    %c0_40 = arith.constant 0 : index
    %86 = vector.load %arg5[%c0_39, %c0_40] : memref<4x32xbf16, #tpu.memory_space<vmem>>, vector<4x32xbf16>
    %cst_41 = arith.constant dense<0.000000e+00> : vector<64x32xf32>
    %87 = tpu.matmul %85, %86, %cst_41 {dimension_numbers = #tpu.dot_dimension_numbers<[1], [0], [0], [1], [0, 0, 1, 1], [], []>} : vector<64x4xbf16>, vector<4x32xbf16>, vector<64x32xf32> -> vector<64x32xf32>
    %88 = vector.shape_cast %87 : vector<64x32xf32> to vector<8x8x32xf32>
    %89 = arith.extf %65 : vector<8x8x32xbf16> to vector<8x8x32xf32>
    %90 = arith.mulf %88, %89 : vector<8x8x32xf32>
    %cst_42 = arith.constant dense<0.000000e+00> : vector<8x32xf32>
    %91 = vector.multi_reduction <add>, %90, %cst_42 [1] : vector<8x8x32xf32> to vector<8x32xf32>
    %92 = arith.truncf %91 : vector<8x32xf32> to vector<8x32xbf16>
    %c0_43 = arith.constant 0 : index
    %c0_44 = arith.constant 0 : index
    %c0_45 = arith.constant 0 : index
    %93 = vector.load %arg11[%c0_43, %c0_44, %c0_45] : memref<1x32x32xbf16, #tpu.memory_space<vmem>>, vector<1x32x32xbf16>
    %94 = vector.shape_cast %93 : vector<1x32x32xbf16> to vector<32x32xbf16>
    %cst_46 = arith.constant dense<0.000000e+00> : vector<8x32xf32>
    %95 = tpu.matmul %92, %94, %cst_46 {dimension_numbers = #tpu.dot_dimension_numbers<[1], [0], [0], [1], [0, 0, 1, 1], [], []>} : vector<8x32xbf16>, vector<32x32xbf16>, vector<8x32xf32> -> vector<8x32xf32>
    %c0_47 = arith.constant 0 : index
    %c4 = arith.constant 4 : index
    %c0_48 = arith.constant 0 : index
    %96 = vector.load %arg14[%c0_47, %c4, %c0_48] : memref<1x12x32xf32, #tpu.memory_space<vmem>>, vector<1x1x32xf32>
    %97 = vector.shape_cast %96 : vector<1x1x32xf32> to vector<1x32xf32>
    %98 = vector.broadcast %97 : vector<1x32xf32> to vector<8x32xf32>
    %99 = arith.addf %95, %98 : vector<8x32xf32>
    %100 = arith.addf %38, %99 : vector<8x32xf32>
    %c0_49 = arith.constant 0 : index
    %c8 = arith.constant 8 : index
    %c0_50 = arith.constant 0 : index
    %101 = vector.load %arg14[%c0_49, %c8, %c0_50] : memref<1x12x32xf32, #tpu.memory_space<vmem>>, vector<1x1x32xf32>
    %102 = vector.shape_cast %101 : vector<1x1x32xf32> to vector<1x32xf32>
    %c0_51 = arith.constant 0 : index
    %c9 = arith.constant 9 : index
    %c0_52 = arith.constant 0 : index
    %103 = vector.load %arg14[%c0_51, %c9, %c0_52] : memref<1x12x32xf32, #tpu.memory_space<vmem>>, vector<1x1x32xf32>
    %104 = vector.shape_cast %103 : vector<1x1x32xf32> to vector<1x32xf32>
    %cst_53 = arith.constant dense<0.000000e+00> : vector<8xf32>
    %105 = vector.multi_reduction <add>, %100, %cst_53 [1] : vector<8x32xf32> to vector<8xf32>
    %106 = vector.shape_cast %105 : vector<8xf32> to vector<8x1xf32>
    %cst_54 = arith.constant 3.200000e+01 : f32
    %107 = vector.broadcast %cst_54 : f32 to vector<8x1xf32>
    %108 = arith.divf %106, %107 : vector<8x1xf32>
    %109 = vector.broadcast %108 : vector<8x1xf32> to vector<8x32xf32>
    %110 = arith.subf %100, %109 : vector<8x32xf32>
    %111 = arith.mulf %110, %110 : vector<8x32xf32>
    %cst_55 = arith.constant dense<0.000000e+00> : vector<8xf32>
    %112 = vector.multi_reduction <add>, %111, %cst_55 [1] : vector<8x32xf32> to vector<8xf32>
    %113 = vector.shape_cast %112 : vector<8xf32> to vector<8x1xf32>
    %cst_56 = arith.constant 3.200000e+01 : f32
    %114 = vector.broadcast %cst_56 : f32 to vector<8x1xf32>
    %115 = arith.divf %113, %114 : vector<8x1xf32>
    %116 = vector.broadcast %108 : vector<8x1xf32> to vector<8x32xf32>
    %117 = arith.subf %100, %116 : vector<8x32xf32>
    %cst_57 = arith.constant 9.99999974E-6 : f32
    %118 = vector.broadcast %cst_57 : f32 to vector<8x1xf32>
    %119 = arith.addf %115, %118 : vector<8x1xf32>
    %120 = math.rsqrt %119 : vector<8x1xf32>
    %121 = vector.broadcast %120 : vector<8x1xf32> to vector<8x32xf32>
    %122 = arith.mulf %117, %121 : vector<8x32xf32>
    %123 = vector.broadcast %102 : vector<1x32xf32> to vector<8x32xf32>
    %124 = arith.mulf %122, %123 : vector<8x32xf32>
    %125 = vector.broadcast %104 : vector<1x32xf32> to vector<8x32xf32>
    %126 = arith.addf %124, %125 : vector<8x32xf32>
    %127 = arith.truncf %126 : vector<8x32xf32> to vector<8x32xbf16>
    %c0_58 = arith.constant 0 : index
    %c0_59 = arith.constant 0 : index
    %c0_60 = arith.constant 0 : index
    %128 = vector.load %arg12[%c0_58, %c0_59, %c0_60] : memref<1x32x128xbf16, #tpu.memory_space<vmem>>, vector<1x32x128xbf16>
    %129 = vector.shape_cast %128 : vector<1x32x128xbf16> to vector<32x128xbf16>
    %cst_61 = arith.constant dense<0.000000e+00> : vector<8x128xf32>
    %130 = tpu.matmul %127, %129, %cst_61 {dimension_numbers = #tpu.dot_dimension_numbers<[1], [0], [0], [1], [0, 0, 1, 1], [], []>} : vector<8x32xbf16>, vector<32x128xbf16>, vector<8x128xf32> -> vector<8x128xf32>
    %c0_62 = arith.constant 0 : index
    %c0_63 = arith.constant 0 : index
    %c0_64 = arith.constant 0 : index
    %131 = vector.load %arg15[%c0_62, %c0_63, %c0_64] : memref<1x1x128xf32, #tpu.memory_space<vmem>>, vector<1x1x128xf32>
    %132 = vector.shape_cast %131 : vector<1x1x128xf32> to vector<1x128xf32>
    %133 = vector.broadcast %132 : vector<1x128xf32> to vector<8x128xf32>
    %134 = arith.addf %130, %133 : vector<8x128xf32>
    %cst_65 = arith.constant 0.000000e+00 : f32
    %135 = vector.broadcast %cst_65 : f32 to vector<8x128xf32>
    %136 = arith.maximumf %134, %135 : vector<8x128xf32>
    %137 = arith.truncf %136 : vector<8x128xf32> to vector<8x128xbf16>
    %c0_66 = arith.constant 0 : index
    %c0_67 = arith.constant 0 : index
    %c0_68 = arith.constant 0 : index
    %138 = vector.load %arg13[%c0_66, %c0_67, %c0_68] : memref<1x128x32xbf16, #tpu.memory_space<vmem>>, vector<1x128x32xbf16>
    %139 = vector.shape_cast %138 : vector<1x128x32xbf16> to vector<128x32xbf16>
    %cst_69 = arith.constant dense<0.000000e+00> : vector<8x32xf32>
    %140 = tpu.matmul %137, %139, %cst_69 {dimension_numbers = #tpu.dot_dimension_numbers<[1], [0], [0], [1], [0, 0, 1, 1], [], []>} : vector<8x128xbf16>, vector<128x32xbf16>, vector<8x32xf32> -> vector<8x32xf32>
    %c0_70 = arith.constant 0 : index
    %c5 = arith.constant 5 : index
    %c0_71 = arith.constant 0 : index
    %141 = vector.load %arg14[%c0_70, %c5, %c0_71] : memref<1x12x32xf32, #tpu.memory_space<vmem>>, vector<1x1x32xf32>
    %142 = vector.shape_cast %141 : vector<1x1x32xf32> to vector<1x32xf32>
    %143 = vector.broadcast %142 : vector<1x32xf32> to vector<8x32xf32>
    %144 = arith.addf %140, %143 : vector<8x32xf32>
    %145 = arith.addf %126, %144 : vector<8x32xf32>
    %c0_72 = arith.constant 0 : index
    %c10 = arith.constant 10 : index
    %c0_73 = arith.constant 0 : index
    %146 = vector.load %arg14[%c0_72, %c10, %c0_73] : memref<1x12x32xf32, #tpu.memory_space<vmem>>, vector<1x1x32xf32>
    %147 = vector.shape_cast %146 : vector<1x1x32xf32> to vector<1x32xf32>
    %c0_74 = arith.constant 0 : index
    %c11 = arith.constant 11 : index
    %c0_75 = arith.constant 0 : index
    %148 = vector.load %arg14[%c0_74, %c11, %c0_75] : memref<1x12x32xf32, #tpu.memory_space<vmem>>, vector<1x1x32xf32>
    %149 = vector.shape_cast %148 : vector<1x1x32xf32> to vector<1x32xf32>
    %cst_76 = arith.constant dense<0.000000e+00> : vector<8xf32>
    %150 = vector.multi_reduction <add>, %145, %cst_76 [1] : vector<8x32xf32> to vector<8xf32>
    %151 = vector.shape_cast %150 : vector<8xf32> to vector<8x1xf32>
    %cst_77 = arith.constant 3.200000e+01 : f32
    %152 = vector.broadcast %cst_77 : f32 to vector<8x1xf32>
    %153 = arith.divf %151, %152 : vector<8x1xf32>
    %154 = vector.broadcast %153 : vector<8x1xf32> to vector<8x32xf32>
    %155 = arith.subf %145, %154 : vector<8x32xf32>
    %156 = arith.mulf %155, %155 : vector<8x32xf32>
    %cst_78 = arith.constant dense<0.000000e+00> : vector<8xf32>
    %157 = vector.multi_reduction <add>, %156, %cst_78 [1] : vector<8x32xf32> to vector<8xf32>
    %158 = vector.shape_cast %157 : vector<8xf32> to vector<8x1xf32>
    %cst_79 = arith.constant 3.200000e+01 : f32
    %159 = vector.broadcast %cst_79 : f32 to vector<8x1xf32>
    %160 = arith.divf %158, %159 : vector<8x1xf32>
    %161 = vector.broadcast %153 : vector<8x1xf32> to vector<8x32xf32>
    %162 = arith.subf %145, %161 : vector<8x32xf32>
    %cst_80 = arith.constant 9.99999974E-6 : f32
    %163 = vector.broadcast %cst_80 : f32 to vector<8x1xf32>
    %164 = arith.addf %160, %163 : vector<8x1xf32>
    %165 = math.rsqrt %164 : vector<8x1xf32>
    %166 = vector.broadcast %165 : vector<8x1xf32> to vector<8x32xf32>
    %167 = arith.mulf %162, %166 : vector<8x32xf32>
    %168 = vector.broadcast %147 : vector<1x32xf32> to vector<8x32xf32>
    %169 = arith.mulf %167, %168 : vector<8x32xf32>
    %170 = vector.broadcast %149 : vector<1x32xf32> to vector<8x32xf32>
    %171 = arith.addf %169, %170 : vector<8x32xf32>
    %c0_81 = arith.constant 0 : index
    %c0_82 = arith.constant 0 : index
    %172 = vector.load %arg17[%c0_81, %c0_82] : memref<8x32xf32, #tpu.memory_space<vmem>>, vector<8x32xf32>
    tpu.vector_store %arg17[%c0_81, %c0_82], %171 {strides = array<i32>} : memref<8x32xf32, #tpu.memory_space<vmem>>, vector<8x32xf32>,
    %c1_i32 = arith.constant 1 : i32
    %173 = arith.cmpi eq, %arg1, %c1_i32 : i32
    %174 = arith.extui %173 : i1 to i32
    %c0_i32_83 = arith.constant 0 : i32
    %175 = arith.cmpi ne, %174, %c0_i32_83 : i32
    scf.if %175 {
      %c0_84 = arith.constant 0 : index
      %c0_85 = arith.constant 0 : index
      %176 = vector.load %arg6[%c0_84, %c0_85] : memref<1x32xf32, #tpu.memory_space<vmem>>, vector<1x32xf32>
      %177 = vector.broadcast %176 : vector<1x32xf32> to vector<8x32xf32>
      %178 = arith.mulf %171, %177 : vector<8x32xf32>
      %cst_86 = arith.constant dense<0.000000e+00> : vector<8xf32>
      %179 = vector.multi_reduction <add>, %178, %cst_86 [1] : vector<8x32xf32> to vector<8xf32>
      %180 = vector.shape_cast %179 : vector<8xf32> to vector<8x1xf32>
      %c0_87 = arith.constant 0 : index
      %c0_88 = arith.constant 0 : index
      %181 = vector.load %arg7[%c0_87, %c0_88] : memref<1x1xf32, #tpu.memory_space<vmem>>, vector<1x1xf32>
      %182 = vector.broadcast %181 : vector<1x1xf32> to vector<8x1xf32>
      %183 = arith.addf %180, %182 : vector<8x1xf32>
      %184 = vector.shape_cast %183 : vector<8x1xf32> to vector<8x1xf32>
      %185 = vector.broadcast %184 : vector<8x1xf32> to vector<8x128xf32>
      %c0_89 = arith.constant 0 : index
      %c0_90 = arith.constant 0 : index
      %186 = vector.load %arg16[%c0_89, %c0_90] : memref<8x128xf32, #tpu.memory_space<vmem>>, vector<8x128xf32>
      tpu.vector_store %arg16[%c0_89, %c0_90], %185 {strides = array<i32>} : memref<8x128xf32, #tpu.memory_space<vmem>>, vector<8x128xf32>,
    } else {
    }
    return
  }
  func.func @transform_0(%arg0: i32, %arg1: i32) -> (i32, i32, i32) {
    %c0_i32 = arith.constant 0 : i32
    %c0_i32_0 = arith.constant 0 : i32
    %c0_i32_1 = arith.constant 0 : i32
    return %arg0, %c0_i32, %c0_i32_0 : i32, i32, i32
  }
  func.func @transform_1(%arg0: i32, %arg1: i32) -> (i32, i32) {
    %c0_i32 = arith.constant 0 : i32
    %c0_i32_0 = arith.constant 0 : i32
    %c0_i32_1 = arith.constant 0 : i32
    return %c0_i32, %c0_i32_0 : i32, i32
  }
  func.func @transform_2(%arg0: i32, %arg1: i32) -> (i32, i32) {
    %c0_i32 = arith.constant 0 : i32
    %c0_i32_0 = arith.constant 0 : i32
    %c0_i32_1 = arith.constant 0 : i32
    return %c0_i32, %c0_i32_0 : i32, i32
  }
  func.func @transform_3(%arg0: i32, %arg1: i32) -> (i32, i32) {
    %c0_i32 = arith.constant 0 : i32
    %c0_i32_0 = arith.constant 0 : i32
    %c0_i32_1 = arith.constant 0 : i32
    return %c0_i32, %c0_i32_0 : i32, i32
  }
  func.func @transform_4(%arg0: i32, %arg1: i32) -> (i32, i32) {
    %c0_i32 = arith.constant 0 : i32
    %c0_i32_0 = arith.constant 0 : i32
    %c0_i32_1 = arith.constant 0 : i32
    return %c0_i32, %c0_i32_0 : i32, i32
  }
  func.func @transform_5(%arg0: i32, %arg1: i32) -> (i32, i32) {
    %c0_i32 = arith.constant 0 : i32
    %c0_i32_0 = arith.constant 0 : i32
    %c0_i32_1 = arith.constant 0 : i32
    return %c0_i32, %c0_i32_0 : i32, i32
  }
  func.func @transform_6(%arg0: i32, %arg1: i32) -> (i32, i32, i32) {
    %c0_i32 = arith.constant 0 : i32
    %c0_i32_0 = arith.constant 0 : i32
    %c0_i32_1 = arith.constant 0 : i32
    return %arg1, %c0_i32, %c0_i32_0 : i32, i32, i32
  }
  func.func @transform_7(%arg0: i32, %arg1: i32) -> (i32, i32, i32) {
    %c0_i32 = arith.constant 0 : i32
    %c0_i32_0 = arith.constant 0 : i32
    %c0_i32_1 = arith.constant 0 : i32
    return %arg1, %c0_i32, %c0_i32_0 : i32, i32, i32
  }
  func.func @transform_8(%arg0: i32, %arg1: i32) -> (i32, i32, i32) {
    %c0_i32 = arith.constant 0 : i32
    %c0_i32_0 = arith.constant 0 : i32
    %c0_i32_1 = arith.constant 0 : i32
    return %arg1, %c0_i32, %c0_i32_0 : i32, i32, i32
  }
  func.func @transform_9(%arg0: i32, %arg1: i32) -> (i32, i32, i32) {
    %c0_i32 = arith.constant 0 : i32
    %c0_i32_0 = arith.constant 0 : i32
    %c0_i32_1 = arith.constant 0 : i32
    return %arg1, %c0_i32, %c0_i32_0 : i32, i32, i32
  }
  func.func @transform_10(%arg0: i32, %arg1: i32) -> (i32, i32, i32) {
    %c0_i32 = arith.constant 0 : i32
    %c0_i32_0 = arith.constant 0 : i32
    %c0_i32_1 = arith.constant 0 : i32
    return %arg1, %c0_i32, %c0_i32_0 : i32, i32, i32
  }
  func.func @transform_11(%arg0: i32, %arg1: i32) -> (i32, i32, i32) {
    %c0_i32 = arith.constant 0 : i32
    %c0_i32_0 = arith.constant 0 : i32
    %c0_i32_1 = arith.constant 0 : i32
    return %arg1, %c0_i32, %c0_i32_0 : i32, i32, i32
  }
  func.func @transform_12(%arg0: i32, %arg1: i32) -> (i32, i32, i32) {
    %c0_i32 = arith.constant 0 : i32
    %c0_i32_0 = arith.constant 0 : i32
    %c0_i32_1 = arith.constant 0 : i32
    return %arg1, %c0_i32, %c0_i32_0 : i32, i32, i32
  }
  func.func @transform_13(%arg0: i32, %arg1: i32) -> (i32, i32, i32) {
    %c0_i32 = arith.constant 0 : i32
    %c0_i32_0 = arith.constant 0 : i32
    %c0_i32_1 = arith.constant 0 : i32
    return %arg1, %c0_i32, %c0_i32_0 : i32, i32, i32
  }
  func.func @transform_14(%arg0: i32, %arg1: i32) -> (i32, i32) {
    %c0_i32 = arith.constant 0 : i32
    %c0_i32_0 = arith.constant 0 : i32
    return %arg0, %c0_i32 : i32, i32
  }
}

</mosaic_0001>

<bundles_post_ra>
// kernel: tpu_custom_call.1
= control target key start
LH: loop header
LB: loop body
LE: loop exit
PB: predicated region body
PF: predicated region fallthrough
CT: control target
= control target key end

     0   :  { %s2944_s0 = inlined_call_operand.vmem [shape: bf16[8,8,32], index: 0, kind: input, shape index: {}]   ;;  %s2945_s1 = inlined_call_operand.vmem [shape: f32[1,32], index: 1, kind: input, shape index: {}]   ;;  %s2946_s2 = inlined_call_operand.vmem [shape: bf16[32,4], index: 2, kind: input, shape index: {}]   ;;  %s2947_s3 = inlined_call_operand.vmem [shape: bf16[4,32], index: 3, kind: input, shape index: {}]   ;;  %s2948_s4 = inlined_call_operand.vmem [shape: f32[1,32], index: 4, kind: input, shape index: {}]   ;;  %s2949_s5 = inlined_call_operand.<no memory space> [shape: f32[1,1], index: 5, kind: input, shape index: {}]   ;;  %s2950_s6 = inlined_call_operand.vmem [shape: bf16[2,32,32], index: 6, kind: input, shape index: {}]   ;;  %s2951_s7 = inlined_call_operand.vmem [shape: bf16[2,32,32], index: 7, kind: input, shape index: {}]   ;;  %s2952_s8 = inlined_call_operand.vmem [shape: bf16[2,32,64], index: 8, kind: input, shape index: {}]   ;;  %s2953_s9 = inlined_call_operand.vmem [shape: bf16[2,32,32], index: 9, kind: input, shape index: {}]   ;;  %s2954_s10 = inlined_call_operand.vmem [shape: bf16[2,32,128], index: 10, kind: input, shape index: {}]   ;;  %s2955_s11 = inlined_call_operand.vmem [shape: bf16[2,128,32], index: 11, kind: input, shape index: {}]   ;;  %s2956_s12 = inlined_call_operand.vmem [shape: f32[2,12,32], index: 12, kind: input, shape index: {}]   ;;  %s2957_s13 = inlined_call_operand.vmem [shape: f32[2,1,128], index: 13, kind: input, shape index: {}]   ;;  %s2958_s14 = inlined_call_operand.hbm [shape: f32[8,128], index: 14, kind: output, shape index: {}]  }
   0x1   :  { %2962 = sst [smem:[#allocation10_spill]] %s2950_s6  ;;  %v19_v0 = vstv %s2949_s5 }
   0x2   :  { %2963 = sst [smem:[#allocation11_spill]] %s2951_s7  ;;  %20 = vst [vmem:[#allocation3] sm:$0x1] %v19_v0 }
   0x3   :  { %2964 = sst [smem:[#allocation12_spill]] %s2952_s8 }
   0x4   :  { %2965 = sst [smem:[#allocation13_spill]] %s2958_s14 }
   0x5   :  { %21 = vsyncpa [#allocation5], 0  ;;  %s2673_s15 = smov 0   ;;  %s2675_s16 = smov 0  }
   0x6   :  { %s2677_s17 = smov 0  }
   0x7 LB: > { %2966 = sst [smem:[#allocation7_spill]] %s2582_s16  ;;  %s36_s18 = sadd.s32 1, %s2582_s16  ;;  %s2586_s17 = sphi %s2677_s17, %s27_s17   ;;  %s2582_s16 = sphi %s2675_s16, %s2978_s16   ;;  %s2578_s15 = sphi %s2673_s15, %s2977_s15  }
   0x8   : > { %2967 = sst [smem:[#allocation8_spill]] %s2586_s17  ;;  %p37_p0 = scmp.ge.s32.totalorder %s36_s18, 2 }
   0x9   : > { %p2157_p1 = scmp.ge.s32.totalorder %s2586_s17, 1  ;;  %p506_p2 = scmp.lt.s32.totalorder %s2586_s17, 3 }
   0xa   : > { %s2980_s18 = smov (%p37_p0, %s36_s18), 0 }
   0xb   : > { %2968 = sst [smem:[#allocation9_spill]] %s2980_s18  ;;  %p507_p3 = pnand %p2157_p1, %p506_p2 }
   0xc   : > { %p591_p4 = scmp.lt.s32.totalorder (!%p507_p3), %s2578_s15, 1  ;;  %s2969_s6 = sld [smem:[#allocation10_spill]] (!%p507_p3) }
   0xd   : > { %510 = sbr.rel (%p507_p3) target bundleno = 2919 (0xb67), region = 76  ;;  %s2970_s7 = sld [smem:[#allocation11_spill]] (!%p507_p3) }
   0xe   : > { %s2971_s8 = sld [smem:[#allocation12_spill]] (!%p507_p3)  ;;  %p2172_p5 = scmp.ne.s32.totalorder (!%p507_p3), %s2578_s15, 0 }
  0x14   : > { %s2696_s19 = scalar_select %p591_p4, %s2578_s15, 1 }
  0x15   : > { %633 = sbr.rel (%p2172_p5) target bundleno = 28 (0x1c), region = 80  ;;  %v2173_v1 = vld [vmem:[%s2945_s1] ss:$0 sm:$0xff] (!%p2172_p5)  ;;  %vm641_vm0 = vcmask (!%p2172_p5), 261120  }
  0x16   : > { %s2262_s20 = sshll.u32 %s2696_s19, 4  ;;  %s2267_s21 = sshll.u32 %s2696_s19, 6  ;;  %642 = vst.msk [vmem:[#allocation2] sm:$0xff] (!%p2172_p5), %vm641_vm0, %v2173_v1 }
  0x17   : > { %s595_s24 = scalar_lea.vmem %s2969_s6, %s2262_s20  ;;  %s2706_s27 = scalar_lea.vmem %s2970_s7, %s2262_s20 }
  0x18   : > { %s2711_s30 = scalar_lea.vmem %s2971_s8, %s2262_s20  ;;  %s2716_s16 = scalar_lea.vmem %s2953_s9, %s2262_s20 }
  0x19   : > { %s2721_s22 = scalar_lea.vmem %s2954_s10, %s2262_s20  ;;  %s2726_s25 = scalar_lea.vmem %s2955_s11, %s2267_s21 }
  0x1a   : > { %s2731_s28 = scalar_lea.vmem %s2956_s12, %s2262_s20  ;;  %s628_s5 = scalar_lea.vmem %s2957_s13, %s2696_s19 }
  0x1c PF: > { %v2471_v2 = vld [vmem:[%s595_s24] sm:$0xff]   ;;  %v2588_v3 = vmov 0.0   ;;  %v2472_v4 = vld [vmem:[%s595_s24 + $0x8] sm:$0xff]   ;;  %vm2589_vm1 = vmmov 0   ;;  %vm666_vm2 = vcmask 261120   ;;  %v2479_v27 = vld [vmem:[%s2944_s0 + $0x10] sm:$0xff]   ;;  %v1022_v0 = vlaneseq }
  0x1d   : > { %2327 = vmatprep.subr.bf16.mxu1 %v2588_v3  ;;  %2331 = vmatprep.mubr.msk.bf16.mxu1 %vm2589_vm1, %v2588_v3  ;;  %v643_v5 = vld [vmem:[#allocation2] sm:$0xff]  ;;  %v2474_v21 = vld [vmem:[%s2706_s27 + $0x8] sm:$0xff]   ;;  %s2590_s24 = smov 32   ;;  %v2480_v28 = vld [vmem:[%s2944_s0 + $0x18] sm:$0xff]   ;;  %s2591_s17 = smov 96   ;;  %vm1462_vm3 = vcmask 1041408  }
  0x1e   : > { %2328 = vmatpush3.bf16.msra.mxu1 %v2471_v2  ;;  %v644_v6 = vpack.c.bf16 %v643_v5, %v643_v5  ;;  %v2174_v7 = vld [vmem:[%s2731_s28] ss:$0 sm:$0xff]  ;;  %v2476_v23 = vld [vmem:[%s2711_s30 + $0x8] sm:$0xff]   ;;  %v2203_v26 = vld [vmem:[%s2731_s28 + $0x3] ss:$0 sm:$0xff]  ;;  %v1023_v2 = vshrl.u32 %v1022_v0, 7 }
  0x1f   : > { %2329 = vmatprep.subr.bf16.mxu1 %v2588_v3  ;;  %v2473_v20 = vld [vmem:[%s2706_s27] sm:$0xff]   ;;  %v2478_v25 = vld [vmem:[%s2944_s0 + $0x8] sm:$0xff]   ;;  %974 = vrot.lane.b32.xlu1 %v2203_v26, %s2590_s24  ;;  %v2592_v62 = vmov 1966171168   ;;  %vm1268_vm4 = vcmask 31744   ;;  %vm1668_vm5 = vcmask 1041409  }
  0x20   : > { %v2475_v22 = vld [vmem:[%s2711_s30] sm:$0xff]   ;;  %v2482_v55 = vld [vmem:[%s2946_s2 + $0x8] sm:$0xff]   ;;  %v1020_v63 = vunpack.c.l.s4 %v2592_v62  ;;  %vm1670_vm6 = vcmask 1042434   ;;  %vm1672_vm7 = vcmask 1043459   ;;  %vm1674_vm8 = vcmask 1044484   ;;  %p2255_p6 = scmp.ne.s32.totalorder %s2578_s15, 1 }
  0x21   : > { %2343 = vmatprep.subr.bf16.mxu0 %v2475_v22  ;;  %v2477_v24 = vld [vmem:[%s2944_s0] sm:$0xff]   ;;  %vm1676_vm9 = vcmask 1045509   ;;  %vm1678_vm10 = vcmask 1046534   ;;  %vm1680_vm11 = vcmask 1047559  }
  0x22   : > { %2330 = vmatpush3.bf16.msra.mxu1 %v2472_v4  ;;  %2344 = vmatpush3.bf16.msra.mxu0 %v2475_v22  ;;  %v2178_v33 = vld [vmem:[%s2731_s28 + $0x6] ss:$0 sm:$0xff]  ;;  %v2179_v35 = vld [vmem:[%s2731_s28 + $0x7] ss:$0 sm:$0xff]  ;;  %v1021_v1 = vunpack.c.0.s8 %v1020_v63  ;;  %v2180_v4 = vld [vmem:[%s2731_s28 + $0x1] ss:$0 sm:$0xff] }
  0x23   : > { %2335 = vmatprep.subr.bf16.mxu1 %v2588_v3  ;;  %2345 = vmatprep.subr.bf16.mxu0 %v2476_v23  ;;  %v2481_v51 = vld [vmem:[%s2946_s2] sm:$0xff]   ;;  %v1061_v22 = vsub.s32 0, %v1023_v2 }
  0x24   : > { %2347 = vmatprep.mubr.msk.bf16.mxu0 %vm666_vm2, %v2477_v24 }
  0x25   : > { %2332 = vmatmul.mubr.msk.bf16.vlgmr.msra.gmra.mrb[0].mxu1 %vm666_vm2, %v644_v6 }
  0x26   : > { %2339 = vmatprep.mubr.msk.bf16.mxu1 %vm2589_vm1, %v2588_v3  ;;  %2336 = vmatpush3.bf16.msra.mxu1 %v2473_v20 }
  0x27   : > { %2337 = vmatprep.subr.bf16.mxu1 %v2588_v3  ;;  %2346 = vmatpush3.bf16.msra.mxu0 %v2476_v23 }
  0x2a   : > { %2338 = vmatpush3.bf16.msra.mxu1 %v2474_v21  ;;  %2348 = vmatmul.mubr.msk.bf16.vlgmr.msra.gmra.mrb[0].mxu0 %vm666_vm2, %v2478_v25 }
  0x2b   : > { %2351 = vmatprep.mubr.msk.bf16.mxu0 %vm666_vm2, %v2479_v27  ;;  %2355 = vmatprep.subr.bf16.mxu1 %v2481_v51 }
  0x32   : > { %2352 = vmatmul.mubr.msk.bf16.gmra.mrb[4].mxu0 %vm666_vm2, %v2480_v28 }
  0x91   : > { %v975_v42 = vpop.permute.xlu1 %974 }
  0xf8   : > { %v704_v8 = vpop.f32.mrb[0].mxu1 }
  0xf9   : > { %v705_v9 = vadd.f32 %v2174_v7, %v704_v8  ;;  %v2333_v10 = vpop.f32.mrb[1].mxu1  ;;  %v1024_v7 = vsub.s32 %v1021_v1, %v1023_v2 }
  0xfa   : > { %v707_v11 = vpop.f32.mrb[2].mxu1 }
  0xfb   : > { %v2334_v12 = vpop.f32.mrb[3].mxu1  ;;  %v710_v13 = vadd.f32 %v705_v9, %v643_v5  ;;  %v2194_v9 = vld [vmem:[%s2731_s28 + $0x2] ss:$0 sm:$0xff] }
  0xfd   : > { %v713_v14 = vsel %vm666_vm2, %v710_v13, 0.0  ;;  %v2349_v39 = vpop.f32.mrb[0].mxu0 }
  0xfe   : > { %714 = vadd.xlane.f32.xlu0 %v713_v14  ;;  %v892_v40 = vpop.f32.mrb[1].mxu0  ;;  %v979_v48 = vadd.f32 %v2349_v39, %v975_v42 }
  0xff   : > { %v2350_v41 = vpop.f32.mrb[2].mxu0  ;;  %v977_v46 = vadd.f32 %v975_v42, %v892_v40  ;;  %v928_v14 = vadd.f32 %v2194_v9, %v892_v40 }
 0x100   : > { %v895_v43 = vpop.f32.mrb[3].mxu0  ;;  %v980_v49 = vadd.f32 %v2350_v41, %v975_v42 }
 0x101   : > { %v978_v44 = vadd.f32 %v975_v42, %v895_v43  ;;  %v2269_v24 = vpack.c.bf16 %v928_v14, %v928_v14 }
 0x102   : > { %v2456_v59 = vpack.i.bf16 %v980_v49, %v979_v48 }
 0x103   : > { %v2451_v56 = vpack.i.bf16 %v978_v44, %v977_v46 }
 0x105   : > { %v2353_v45 = vpop.f32.mrb[4].mxu0  ;;  %2452 = vrot.lane.b32.xlu1 %v2451_v56, %s2591_s17 }
 0x106   : > { %v908_v47 = vpop.f32.mrb[5].mxu0  ;;  %v983_v57 = vadd.f32 %v2353_v45, %v975_v42 }
 0x107   : > { %v2354_v50 = vpop.f32.mrb[6].mxu0  ;;  %v981_v53 = vadd.f32 %v975_v42, %v908_v47 }
 0x108   : > { %v911_v52 = vpop.f32.mrb[7].mxu0  ;;  %v984_v58 = vadd.f32 %v2354_v50, %v975_v42 }
 0x109   : > { %v982_v54 = vadd.f32 %v975_v42, %v911_v52  ;;  %v933_v26 = vadd.f32 %v2194_v9, %v911_v52 }
 0x10a   : > { %v2466_v61 = vpack.i.bf16 %v984_v58, %v983_v57 }
 0x10b   : > { %v2461_v60 = vpack.i.bf16 %v982_v54, %v981_v53  ;;  %v2274_v42 = vpack.c.bf16 %v933_v26, %v933_v26 }
 0x10d   : > { %2462 = vrot.lane.b32.xlu1 %v2461_v60, %s2591_s17 }
 0x111   : > { %2467 = vrot.lane.b32.xlu1 %v2466_v61, %s2591_s17 }
 0x18b   : > { %v715_v15 = vpop.xlane.xlu0 %714 }
 0x18c   : > { %v717_v16 = vmul.f32 0.03125, %v715_v15  ;;  %v2790_v15 = vadd.f32 %v2350_v41, %v2194_v9 }
 0x18e   : > { %v718_v17 = vsub.f32 %v710_v13, %v717_v16  ;;  %v930_v13 = vadd.f32 %v2349_v39, %v2194_v9  ;;  %v2272_v25 = vpack.c.bf16 %v2790_v15, %v2790_v15 }
 0x190   : > { %v719_v18 = vmul.f32 %v718_v17, %v718_v17  ;;  %v2271_v23 = vpack.c.bf16 %v930_v13, %v930_v13 }
 0x192   : > { %v720_v19 = vsel %vm666_vm2, %v719_v18, 0.0  ;;  %v934_v18 = vadd.f32 %v2353_v45, %v2194_v9 }
 0x193   : > { %721 = vadd.xlane.f32.xlu0 %v720_v19  ;;  %v932_v19 = vadd.f32 %v2194_v9, %v908_v47 }
 0x1a9   : > { %2457 = vrot.lane.b32.xlu0 %v2456_v59, %s2591_s17 }
 0x220   : > { %v722_v29 = vpop.xlane.xlu0 %721 }
 0x221   : > { %v723_v30 = vmul.f32 0.03125, %v722_v29 }
 0x223   : > { %v724_v31 = vadd.f32 1e-05, %v723_v30 }
 0x225   : > { %2495 = vrsqrt.f32 %v724_v31 }
 0x22f   : > { %v2496_v32 = vpop.eup %2495 }
 0x230   : > { %v726_v34 = vmul.f32 %v2496_v32, %v718_v17  ;;  %v929_v17 = vadd.f32 %v2194_v9, %v895_v43  ;;  %v2275_v32 = vpack.c.bf16 %v934_v18, %v934_v18 }
 0x232   : > { %v731_v36 = vmul.f32 %v2178_v33, %v726_v34  ;;  %v2270_v31 = vpack.c.bf16 %v929_v17, %v929_v17  ;;  %v2273_v33 = vpack.c.bf16 %v932_v19, %v932_v19  ;;  %v935_v34 = vadd.f32 %v2354_v50, %v2194_v9 }
 0x234   : > { %v2776_v37 = vadd.f32 %v2179_v35, %v731_v36 }
 0x236   : > { %v745_v38 = vpack.c.bf16 %v2776_v37, %v2776_v37 }
 0x238   : > { %2340 = vmatmul.mubr.msk.bf16.vlgmr.msra.gmra.mrb[4].mxu1 %vm666_vm2, %v745_v38 }
 0x239   : > { %2356 = vmatpush3.bf16.msra.mxu1 %v2481_v51 }
 0x23a   : > { %2357 = vmatprep.subr.bf16.mxu1 %v2482_v55 }
 0x23d   : > { %2358 = vmatpush3.bf16.msra.mxu1 %v2482_v55 }
 0x23e   : > { %2377 = vmatprep.subr.bf16.mxu1 %v2588_v3 }
 0x30b   : > { %v804_v5 = vpop.f32.mrb[4].mxu1 }
 0x30c   : > { %v805_v6 = vadd.f32 %v2180_v4, %v804_v5  ;;  %v2341_v8 = vpop.f32.mrb[5].mxu1 }
 0x30d   : > { %v807_v10 = vpop.f32.mrb[6].mxu1  ;;  %v2276_v8 = vpack.c.bf16 %v935_v34, %v935_v34 }
 0x30e   : > { %v1017_v11 = vpack.c.bf16 %v805_v6, %v805_v6  ;;  %v2342_v12 = vpop.f32.mrb[7].mxu1 }
 0x310   : > { %v1025_v16 = vrot.slane %v1017_v11, %v1024_v7 }
 0x312   : > { %v1026_v20 = vcombine.high %v1025_v16, %v1025_v16  ;;  %v1033_v21 = vrot.slane %v1025_v16, %v1024_v7 }
 0x314   : > { %v1040_v27 = vrot.slane %v1026_v20, %v1024_v7  ;;  %v1041_v28 = vcombine.high %v1033_v21, %v1033_v21  ;;  %v1044_v29 = vunpack.i.h.s16 %v1033_v21  ;;  %v2212_v30 = vpack.i.b16 %v1033_v21, %v1033_v21 }
 0x316   : > { %v1042_v35 = vcombine.high %v1040_v27, %v1040_v27  ;;  %v1052_v36 = vpack.i.b16 %v1044_v29, %v1044_v29  ;;  %v2213_v38 = vpack.i.b16 %v1040_v27, %v1040_v27  ;;  %v1062_v39 = vrot.slane %v2212_v30, %v1061_v22 }
 0x317   : > { %v1046_v40 = vunpack.i.h.s16 %v1040_v27  ;;  %v2214_v41 = vpack.i.b16 %v1041_v28, %v1041_v28  ;;  %v1048_v43 = vunpack.i.h.s16 %v1041_v28 }
 0x318   : > { %v1070_v44 = vrot.slane %v2213_v38, %v1061_v22  ;;  %v1092_v45 = vpack.i.b16 %v1062_v39, %v1062_v39  ;;  %v1066_v46 = vrot.slane %v1052_v36, %v1061_v22  ;;  %v2215_v47 = vpack.i.b16 %v1042_v35, %v1042_v35 }
 0x319   : > { %v1054_v48 = vpack.i.b16 %v1046_v40, %v1046_v40  ;;  %v1078_v49 = vrot.slane %v2214_v41, %v1061_v22  ;;  %v1050_v51 = vunpack.i.h.s16 %v1042_v35  ;;  %v1056_v52 = vpack.i.b16 %v1048_v43, %v1048_v43 }
 0x31a   : > { %v1106_v53 = vpack.i.b16 %v1070_v44, %v1070_v44  ;;  %v1097_v54 = vrot.slane %v1092_v45, %v1061_v22  ;;  %v1099_v55 = vpack.i.b16 %v1066_v46, %v1066_v46  ;;  %v1086_v50 = vrot.slane %v2215_v47, %v1061_v22 }
 0x31b   : > { %v1074_v56 = vrot.slane %v1054_v48, %v1061_v22  ;;  %v1120_v57 = vpack.i.b16 %v1078_v49, %v1078_v49  ;;  %v1058_v58 = vpack.i.b16 %v1050_v51, %v1050_v51  ;;  %v1082_v59 = vrot.slane %v1056_v52, %v1061_v22 }
 0x31c   : > { %v1111_v60 = vrot.slane %v1106_v53, %v1061_v22  ;;  %v1147_v61 = vmul.bf16 %v2269_v24, %v1097_v54  ;;  %v1104_v62 = vrot.slane %v1099_v55, %v1061_v22  ;;  %v1134_v63 = vpack.i.b16 %v1086_v50, %v1086_v50 }
 0x31d   : > { %v1113_v0 = vpack.i.b16 %v1074_v56, %v1074_v56  ;;  %v1125_v1 = vrot.slane %v1120_v57, %v1061_v22  ;;  %v1090_v2 = vrot.slane %v1058_v58, %v1061_v22  ;;  %v1127_v4 = vpack.i.b16 %v1082_v59, %v1082_v59 }
 0x31e   : > { %v1149_v5 = vmul.bf16 %v2271_v23, %v1111_v60  ;;  %v1148_v6 = vmul.bf16 %v2270_v31, %v1104_v62  ;;  %v1139_v7 = vrot.slane %v1134_v63, %v1061_v22 }
 0x31f   : > { %v1118_v9 = vrot.slane %v1113_v0, %v1061_v22  ;;  %v1151_v10 = vmul.bf16 %v2273_v33, %v1125_v1  ;;  %v1141_v11 = vpack.i.b16 %v1090_v2, %v1090_v2  ;;  %v1132_v12 = vrot.slane %v1127_v4, %v1061_v22 }
 0x320   : > { %v2216_v13 = vcombine.low %v1147_v61, %v1148_v6  ;;  %v1153_v14 = vmul.bf16 %v2275_v32, %v1139_v7 }
 0x321   : > { %v1150_v15 = vmul.bf16 %v2272_v25, %v1118_v9  ;;  %v1146_v16 = vrot.slane %v1141_v11, %v1061_v22  ;;  %v1152_v17 = vmul.bf16 %v2274_v42, %v1132_v12  ;;  %v1429_v22 = vld [vmem:[%s2947_s3] sm:$0x3] }
 0x322   : > { %2359 = vmatprep.mubr.msk.bf16.mxu1 %vm666_vm2, %v2216_v13  ;;  %2413 = vmatprep.subr.msk.bf16.mxu0 %vm1462_vm3, %v1429_v22  ;;  %v1464_v23 = vsel %vm1462_vm3, %v1429_v22, 0 }
 0x323   : > { %v2217_v18 = vcombine.low %v1149_v5, %v1150_v15  ;;  %v1154_v19 = vmul.bf16 %v2276_v8, %v1146_v16  ;;  %v2218_v20 = vcombine.low %v1151_v10, %v1152_v17  ;;  %2368 = vmatpush3.bf16.msra.mxu0 %v1464_v23 }
 0x324   : > { %2393 = vmatprep.subr.bf16.mxu0 %v2588_v3 }
 0x325   : > { %v2219_v21 = vcombine.low %v1153_v14, %v1154_v19  ;;  %2360 = vmatmul.mubr.msk.bf16.vlgmr.msra.gmra.mrb[8].mxu1 %vm666_vm2, %v2217_v18 }
 0x326   : > { %2363 = vmatprep.mubr.msk.bf16.mxu1 %vm666_vm2, %v2218_v20 }
 0x32d   : > { %2364 = vmatmul.mubr.msk.bf16.gmra.mrb[12].mxu1 %vm666_vm2, %v2219_v21 }
 0x32e   : > { %2381 = vmatprep.mubr.msk.bf16.mxu1 %vm2589_vm1, %v2588_v3 }
 0x3f8   : > { %v2361_v24 = vpop.f32.mrb[8].mxu1 }
 0x3f9   : > { %v1283_v25 = vsel %vm1268_vm4, %v2361_v24, -inf  ;;  %v1237_v26 = vpop.f32.mrb[9].mxu1 }
 0x3fa   : > { %v1284_v27 = vrot.slane %v1283_v25, 4  ;;  %v1269_v28 = vsel %vm1268_vm4, %v1237_v26, -inf  ;;  %v2362_v29 = vpop.f32.mrb[10].mxu1 }
 0x3fb   : > { %v1270_v30 = vrot.slane %v1269_v28, 4  ;;  %v1290_v31 = vsel %vm1268_vm4, %v2362_v29, -inf  ;;  %v1240_v32 = vpop.f32.mrb[11].mxu1 }
 0x3fc   : > { %v1285_v33 = vmax.f32 %v1283_v25, %v1284_v27  ;;  %v1291_v34 = vrot.slane %v1290_v31, 4  ;;  %v1276_v35 = vsel %vm1268_vm4, %v1240_v32, -inf }
 0x3fd   : > { %v1271_v36 = vmax.f32 %v1269_v28, %v1270_v30  ;;  %v1277_v38 = vrot.slane %v1276_v35, 4 }
 0x3fe   : > { %v1286_v39 = vrot.slane %v1285_v33, 2  ;;  %v1292_v40 = vmax.f32 %v1290_v31, %v1291_v34 }
 0x3ff   : > { %v1272_v41 = vrot.slane %v1271_v36, 2  ;;  %v1278_v42 = vmax.f32 %v1276_v35, %v1277_v38 }
 0x400   : > { %v1287_v43 = vmax.f32 %v1285_v33, %v1286_v39  ;;  %v1293_v44 = vrot.slane %v1292_v40, 2  ;;  %v2365_v45 = vpop.f32.mrb[12].mxu1 }
 0x401   : > { %v1273_v46 = vmax.f32 %v1271_v36, %v1272_v41  ;;  %v1279_v47 = vrot.slane %v1278_v42, 2  ;;  %v1311_v48 = vsel %vm1268_vm4, %v2365_v45, -inf  ;;  %v1253_v49 = vpop.f32.mrb[13].mxu1 }
 0x402   : > { %v1288_v51 = vrot.slane %v1287_v43, 1  ;;  %v1294_v52 = vmax.f32 %v1292_v40, %v1293_v44  ;;  %v1312_v53 = vrot.slane %v1311_v48, 4  ;;  %v1297_v54 = vsel %vm1268_vm4, %v1253_v49, -inf  ;;  %v2366_v55 = vpop.f32.mrb[14].mxu1 }
 0x403   : > { %v1274_v50 = vrot.slane %v1273_v46, 1  ;;  %v1280_v56 = vmax.f32 %v1278_v42, %v1279_v47  ;;  %v1298_v57 = vrot.slane %v1297_v54, 4  ;;  %v1318_v58 = vsel %vm1268_vm4, %v2366_v55, -inf  ;;  %v1256_v59 = vpop.f32.mrb[15].mxu1 }
 0x404   : > { %v1289_v60 = vmax.f32 %v1287_v43, %v1288_v51  ;;  %v1295_v61 = vrot.slane %v1294_v52, 1  ;;  %v1313_v62 = vmax.f32 %v1311_v48, %v1312_v53  ;;  %v1319_v63 = vrot.slane %v1318_v58, 4 }
 0x405   : > { %v1275_v0 = vmax.f32 %v1273_v46, %v1274_v50  ;;  %v1281_v1 = vrot.slane %v1280_v56, 1  ;;  %v1299_v2 = vmax.f32 %v1297_v54, %v1298_v57  ;;  %v1304_v4 = vsel %vm1268_vm4, %v1256_v59, -inf }
 0x406   : > { %v1327_v5 = vsub.f32 %v2361_v24, %v1289_v60  ;;  %v1296_v6 = vmax.f32 %v1294_v52, %v1295_v61  ;;  %v1314_v7 = vrot.slane %v1313_v62, 2  ;;  %v1320_v8 = vmax.f32 %v1318_v58, %v1319_v63 }
 0x407   : > { %v1325_v9 = vsub.f32 %v1237_v26, %v1275_v0  ;;  %v1282_v10 = vmax.f32 %v1280_v56, %v1281_v1  ;;  %v1300_v11 = vrot.slane %v1299_v2, 2  ;;  %v1305_v12 = vrot.slane %v1304_v4, 4 }
 0x408   : > { %v1337_v13 = vmul.f32 1.442695, %v1327_v5  ;;  %v1328_v14 = vsub.f32 %v2362_v29, %v1296_v6  ;;  %v1315_v15 = vmax.f32 %v1313_v62, %v1314_v7  ;;  %v1321_v16 = vrot.slane %v1320_v8, 2 }
 0x409   : > { %v1333_v17 = vmul.f32 1.442695, %v1325_v9  ;;  %v1326_v18 = vsub.f32 %v1240_v32, %v1282_v10  ;;  %v1301_v19 = vmax.f32 %v1299_v2, %v1300_v11  ;;  %v1306_v20 = vmax.f32 %v1304_v4, %v1305_v12 }
 0x40a   : > { %2497 = vpow2.f32 %v1337_v13  ;;  %v1339_v21 = vmul.f32 1.442695, %v1328_v14  ;;  %v1316_v22 = vrot.slane %v1315_v15, 1  ;;  %v1322_v23 = vmax.f32 %v1320_v8, %v1321_v16 }
 0x40b   : > { %2499 = vpow2.f32 %v1333_v17  ;;  %v1335_v24 = vmul.f32 1.442695, %v1326_v18  ;;  %v1302_v25 = vrot.slane %v1301_v19, 1  ;;  %v1307_v27 = vrot.slane %v1306_v20, 2 }
 0x40c   : > { %2501 = vpow2.f32 %v1339_v21  ;;  %v1317_v26 = vmax.f32 %v1315_v15, %v1316_v22  ;;  %v1323_v28 = vrot.slane %v1322_v23, 1 }
 0x40d   : > { %2503 = vpow2.f32 %v1335_v24  ;;  %v1303_v30 = vmax.f32 %v1301_v19, %v1302_v25  ;;  %v1308_v29 = vmax.f32 %v1306_v20, %v1307_v27 }
 0x40e   : > { %v1331_v31 = vsub.f32 %v2365_v45, %v1317_v26  ;;  %v1324_v33 = vmax.f32 %v1322_v23, %v1323_v28 }
 0x40f   : > { %v1329_v34 = vsub.f32 %v1253_v49, %v1303_v30  ;;  %v1309_v32 = vrot.slane %v1308_v29, 1 }
 0x410   : > { %v1345_v35 = vmul.f32 1.442695, %v1331_v31  ;;  %v1332_v36 = vsub.f32 %v2366_v55, %v1324_v33 }
 0x411   : > { %v1341_v38 = vmul.f32 1.442695, %v1329_v34  ;;  %v1310_v39 = vmax.f32 %v1308_v29, %v1309_v32 }
 0x412   : > { %2505 = vpow2.f32 %v1345_v35  ;;  %v1347_v40 = vmul.f32 1.442695, %v1332_v36 }
 0x413   : > { %2507 = vpow2.f32 %v1341_v38  ;;  %v1330_v41 = vsub.f32 %v1256_v59, %v1310_v39 }
 0x414   : > { %v2812_v42 = vpop.eup %2497  ;;  %2509 = vpow2.f32 %v1347_v40 }
 0x415   : > { %v2814_v43 = vpop.eup %2499  ;;  %v1363_v44 = vsel %vm1268_vm4, %v2812_v42, 0.0  ;;  %v1343_v45 = vmul.f32 1.442695, %v1330_v41 }
 0x416   : > { %v2818_v46 = vpop.eup %2501  ;;  %v1364_v47 = vrot.slane %v1363_v44, 4  ;;  %v1349_v48 = vsel %vm1268_vm4, %v2814_v43, 0.0 }
 0x417   : > { %v2822_v49 = vpop.eup %2503  ;;  %v1350_v51 = vrot.slane %v1349_v48, 4  ;;  %v1370_v52 = vsel %vm1268_vm4, %v2818_v46, 0.0  ;;  %2511 = vpow2.f32 %v1343_v45 }
 0x418   : > { %v1365_v53 = vadd.f32 %v1364_v47, %v1363_v44  ;;  %v1371_v54 = vrot.slane %v1370_v52, 4  ;;  %v1356_v55 = vsel %vm1268_vm4, %v2822_v49, 0.0 }
 0x419   : > { %v1351_v50 = vadd.f32 %v1350_v51, %v1349_v48  ;;  %v1357_v56 = vrot.slane %v1356_v55, 4 }
 0x41a   : > { %v1366_v57 = vrot.slane %v1365_v53, 2  ;;  %v1372_v58 = vadd.f32 %v1371_v54, %v1370_v52 }
 0x41b   : > { %v1352_v59 = vrot.slane %v1351_v50, 2  ;;  %v1358_v60 = vadd.f32 %v1357_v56, %v1356_v55 }
 0x41c   : > { %v2828_v61 = vpop.eup %2505  ;;  %v1367_v62 = vadd.f32 %v1366_v57, %v1365_v53  ;;  %v1373_v63 = vrot.slane %v1372_v58, 2 }
 0x41d   : > { %v2830_v0 = vpop.eup %2507  ;;  %v1353_v1 = vadd.f32 %v1352_v59, %v1351_v50  ;;  %v1359_v2 = vrot.slane %v1358_v60, 2  ;;  %v1391_v4 = vsel %vm1268_vm4, %v2828_v61, 0.0 }
 0x41e   : > { %v2510_v5 = vpop.eup %2509  ;;  %v1368_v6 = vrot.slane %v1367_v62, 1  ;;  %v1374_v7 = vadd.f32 %v1373_v63, %v1372_v58  ;;  %v1392_v8 = vrot.slane %v1391_v4, 4  ;;  %v1377_v9 = vsel %vm1268_vm4, %v2830_v0, 0.0 }
 0x41f   : > { %v1354_v10 = vrot.slane %v1353_v1, 1  ;;  %v1360_v11 = vadd.f32 %v1359_v2, %v1358_v60  ;;  %v1378_v12 = vrot.slane %v1377_v9, 4  ;;  %v1398_v13 = vsel %vm1268_vm4, %v2510_v5, 0.0 }
 0x420   : > { %v1369_v14 = vadd.f32 %v1368_v6, %v1367_v62  ;;  %v1375_v15 = vrot.slane %v1374_v7, 1  ;;  %v1393_v16 = vadd.f32 %v1392_v8, %v1391_v4  ;;  %v1399_v17 = vrot.slane %v1398_v13, 4  ;;  %v2483_v4 = vld [vmem:[%s2716_s16] sm:$0xff]   ;;  %v2458_v6 = vpop.permute.xlu0 %2457 }
 0x421   : > { %v2512_v18 = vpop.eup %2511  ;;  %v1355_v19 = vadd.f32 %v1354_v10, %v1353_v1  ;;  %v1361_v20 = vrot.slane %v1360_v11, 1  ;;  %v1379_v21 = vadd.f32 %v1378_v12, %v1377_v9  ;;  %2378 = vmatpush3.bf16.msra.mxu1 %v2483_v4  ;;  %v2460_v9 = vunpack.i.h.bf16 %v2458_v6 }
 0x422   : > { %2513 = vrcp.f32 %v1369_v14  ;;  %v1376_v22 = vadd.f32 %v1375_v15, %v1374_v7  ;;  %v1394_v23 = vrot.slane %v1393_v16, 2  ;;  %v1400_v24 = vadd.f32 %v1399_v17, %v1398_v13  ;;  %2379 = vmatprep.subr.bf16.mxu1 %v2588_v3 }
 0x423   : > { %2515 = vrcp.f32 %v1355_v19  ;;  %v1362_v25 = vadd.f32 %v1361_v20, %v1360_v11  ;;  %v1380_v27 = vrot.slane %v1379_v21, 2  ;;  %v1384_v26 = vsel %vm1268_vm4, %v2512_v18, 0.0 }
 0x424   : > { %2517 = vrcp.f32 %v1376_v22  ;;  %v1395_v28 = vadd.f32 %v1394_v23, %v1393_v16  ;;  %v1401_v30 = vrot.slane %v1400_v24, 2  ;;  %v1385_v29 = vrot.slane %v1384_v26, 4 }
 0x425   : > { %2519 = vrcp.f32 %v1362_v25  ;;  %v1381_v31 = vadd.f32 %v1380_v27, %v1379_v21 }
 0x426   : > { %v1396_v33 = vrot.slane %v1395_v28, 1  ;;  %v1402_v34 = vadd.f32 %v1401_v30, %v1400_v24  ;;  %v1386_v32 = vadd.f32 %v1385_v29, %v1384_v26 }
 0x427   : > { %v1382_v35 = vrot.slane %v1381_v31, 1 }
 0x428   : > { %v1397_v36 = vadd.f32 %v1396_v33, %v1395_v28  ;;  %v1403_v38 = vrot.slane %v1402_v34, 1  ;;  %v1387_v39 = vrot.slane %v1386_v32, 2 }
 0x429   : > { %v1383_v40 = vadd.f32 %v1382_v35, %v1381_v31 }
 0x42a   : > { %2521 = vrcp.f32 %v1397_v36  ;;  %v1404_v41 = vadd.f32 %v1403_v38, %v1402_v34  ;;  %v1388_v44 = vadd.f32 %v1387_v39, %v1386_v32 }
 0x42c   : > { %v2514_v45 = vpop.eup %2513  ;;  %2523 = vrcp.f32 %v1404_v41  ;;  %v1389_v47 = vrot.slane %v1388_v44, 1 }
 0x42d   : > { %v2516_v48 = vpop.eup %2515  ;;  %2525 = vrcp.f32 %v1383_v40  ;;  %v1415_v54 = vmul.f32 %v2514_v45, %v2812_v42 }
 0x42e   : > { %v2518_v51 = vpop.eup %2517  ;;  %v1390_v52 = vadd.f32 %v1389_v47, %v1388_v44  ;;  %v1413_v50 = vmul.f32 %v2516_v48, %v2814_v43 }
 0x42f   : > { %v2520_v53 = vpop.eup %2519  ;;  %v1416_v55 = vmul.f32 %v2518_v51, %v2818_v46 }
 0x430   : > { %2527 = vrcp.f32 %v1390_v52  ;;  %v1414_v56 = vmul.f32 %v2520_v53, %v2822_v49 }
 0x431   : > { %v2286_v57 = vpack.c.bf16 %v1416_v55, %v1415_v54 }
 0x432   : > { %v2285_v58 = vpack.c.bf16 %v1414_v56, %v1413_v50 }
 0x434   : > { %v2522_v59 = vpop.eup %2521  ;;  %2369 = vmatprep.mubr.msk.bf16.mxu0 %vm1268_vm4, %v2285_v58 }
 0x435   : > { %2370 = vmatmul.mubr.msk.bf16.vlgmr.msra.gmra.mrb[8].mxu0 %vm1268_vm4, %v2286_v57  ;;  %v1419_v62 = vmul.f32 %v2522_v59, %v2828_v61  ;;  %v2484_v61 = vld [vmem:[%s2716_s16 + $0x8] sm:$0xff]  }
 0x436   : > { %v2524_v60 = vpop.eup %2523  ;;  %2380 = vmatpush3.bf16.msra.mxu1 %v2484_v61 }
 0x437   : > { %v1420_v42 = vmul.f32 %v2524_v60, %v2510_v5  ;;  %v2526_v63 = vpop.eup %2525  ;;  %2385 = vmatprep.subr.bf16.mxu1 %v2588_v3  ;;  %v2453_v5 = vpop.permute.xlu1 %2452 }
 0x438   : > { %v1417_v43 = vmul.f32 %v2526_v63, %v2830_v0  ;;  %v2459_v0 = vunpack.i.l.bf16 %v2458_v6  ;;  %v2454_v7 = vunpack.i.l.bf16 %v2453_v5  ;;  %v2455_v13 = vunpack.i.h.bf16 %v2453_v5 }
 0x439   : > { %v2288_v46 = vpack.c.bf16 %v1420_v42, %v1419_v62 }
 0x43a   : > { %v2528_v1 = vpop.eup %2527 }
 0x43b   : > { %v1418_v2 = vmul.f32 %v2528_v1, %v2512_v18  ;;  %v2463_v10 = vpop.permute.xlu1 %2462 }
 0x43c   : > { %v2464_v38 = vunpack.i.l.bf16 %v2463_v10 }
 0x43d   : > { %v2287_v49 = vpack.c.bf16 %v1418_v2, %v1417_v43 }
 0x43f   : > { %2373 = vmatprep.mubr.msk.bf16.mxu0 %vm1268_vm4, %v2287_v49  ;;  %v2468_v26 = vpop.permute.xlu1 %2467 }
 0x440   : > { %2374 = vmatmul.mubr.msk.bf16.gmra.mrb[12].mxu0 %vm1268_vm4, %v2288_v46  ;;  %v2469_v32 = vunpack.i.l.bf16 %v2468_v26  ;;  %v2470_v44 = vunpack.i.h.bf16 %v2468_v26  ;;  %v2465_v46 = vunpack.i.h.bf16 %v2463_v10 }
 0x441   : > { %2409 = vmatprep.mubr.msk.bf16.mxu0 %vm2589_vm1, %v2588_v3 }
 0x508   : > { %v2371_v8 = vpop.f32.mrb[8].mxu0 }
 0x509   : > { %v1573_v11 = vmul.f32 %v2459_v0, %v2371_v8  ;;  %v1500_v12 = vpop.f32.mrb[9].mxu0 }
 0x50a   : > { %v1571_v14 = vmul.f32 %v2454_v7, %v1500_v12  ;;  %v2372_v15 = vpop.f32.mrb[10].mxu0 }
 0x50b   : > { %v1593_v16 = vsel %vm666_vm2, %v1573_v11, 0.0  ;;  %v1574_v17 = vmul.f32 %v2460_v9, %v2372_v15  ;;  %v1503_v18 = vpop.f32.mrb[11].mxu0 }
 0x50c   : > { %v1594_v19 = vrot.slane %v1593_v16, 4  ;;  %v1579_v20 = vsel %vm666_vm2, %v1571_v14, 0.0  ;;  %v1572_v21 = vmul.f32 %v2455_v13, %v1503_v18 }
 0x50d   : > { %v1580_v22 = vrot.slane %v1579_v20, 4  ;;  %v1600_v23 = vsel %vm666_vm2, %v1574_v17, 0.0 }
 0x50e   : > { %v1595_v24 = vadd.f32 %v1594_v19, %v1593_v16  ;;  %v1601_v25 = vrot.slane %v1600_v23, 4  ;;  %v1586_v27 = vsel %vm666_vm2, %v1572_v21, 0.0 }
 0x50f   : > { %v1581_v28 = vadd.f32 %v1580_v22, %v1579_v20  ;;  %v1587_v30 = vrot.slane %v1586_v27, 4 }
 0x510   : > { %v1596_v29 = vrot.slane %v1595_v24, 2  ;;  %v1602_v31 = vadd.f32 %v1601_v25, %v1600_v23 }
 0x511   : > { %v1582_v33 = vrot.slane %v1581_v28, 2  ;;  %v1588_v34 = vadd.f32 %v1587_v30, %v1586_v27 }
 0x512   : > { %v1597_v35 = vadd.f32 %v1596_v29, %v1595_v24  ;;  %v1603_v36 = vrot.slane %v1602_v31, 2 }
 0x513   : > { %v1583_v39 = vadd.f32 %v1582_v33, %v1581_v28  ;;  %v1589_v40 = vrot.slane %v1588_v34, 2  ;;  %v2375_v41 = vpop.f32.mrb[12].mxu0 }
 0x514   : > { %v1598_v45 = vrot.slane %v1597_v35, 1  ;;  %v1604_v47 = vadd.f32 %v1603_v36, %v1602_v31  ;;  %v1577_v48 = vmul.f32 %v2469_v32, %v2375_v41  ;;  %v1516_v51 = vpop.f32.mrb[13].mxu0 }
 0x515   : > { %v1584_v52 = vrot.slane %v1583_v39, 1  ;;  %v1590_v53 = vadd.f32 %v1589_v40, %v1588_v34  ;;  %v1575_v54 = vmul.f32 %v2464_v38, %v1516_v51  ;;  %v2376_v55 = vpop.f32.mrb[14].mxu0 }
 0x516   : > { %v1599_v50 = vadd.f32 %v1598_v45, %v1597_v35  ;;  %v1605_v56 = vrot.slane %v1604_v47, 1  ;;  %v1621_v57 = vsel %vm666_vm2, %v1577_v48, 0.0  ;;  %v1578_v58 = vmul.f32 %v2470_v44, %v2376_v55  ;;  %v1519_v59 = vpop.f32.mrb[15].mxu0 }
 0x517   : > { %v1585_v60 = vadd.f32 %v1584_v52, %v1583_v39  ;;  %v1591_v62 = vrot.slane %v1590_v53, 1  ;;  %v1622_v42 = vrot.slane %v1621_v57, 4  ;;  %v1607_v63 = vsel %vm666_vm2, %v1575_v54, 0.0 }
 0x518   : > { %v1606_v1 = vadd.f32 %v1605_v56, %v1604_v47  ;;  %v1608_v43 = vrot.slane %v1607_v63, 4  ;;  %v1628_v2 = vsel %vm666_vm2, %v1578_v58, 0.0  ;;  %v1637_v6 = vpack.c.bf16 %v1599_v50, %v1599_v50  ;;  %v2234_v50 = vld [vmem:[%s2731_s28 + $0x4] ss:$0 sm:$0xff] }
 0x519   : > { %v1635_v49 = vpack.c.bf16 %v1585_v60, %v1585_v60  ;;  %v1592_v4 = vadd.f32 %v1591_v62, %v1590_v53  ;;  %v1623_v61 = vadd.f32 %v1622_v42, %v1621_v57  ;;  %v1629_v5 = vrot.slane %v1628_v2, 4 }
 0x51a   : > { %v1609_v0 = vadd.f32 %v1608_v43, %v1607_v63  ;;  %v1576_v7 = vmul.f32 %v2465_v46, %v1519_v59  ;;  %v1638_v8 = vpack.c.bf16 %v1606_v1, %v1606_v1  ;;  %v1662_v19 = vunpack.c.l.b16 %v1637_v6  ;;  %v2490_v6 = vld [vmem:[%s2726_s25 + $0x18] sm:$0xff]  }
 0x51b   : > { %v1636_v9 = vpack.c.bf16 %v1592_v4, %v1592_v4  ;;  %v1624_v11 = vrot.slane %v1623_v61, 2  ;;  %v1630_v12 = vadd.f32 %v1629_v5, %v1628_v2  ;;  %v1660_v13 = vunpack.c.l.b16 %v1635_v49  ;;  %v2485_v49 = vld [vmem:[%s2721_s22] sm:$0xff]   ;;  %v2486_v4 = vld [vmem:[%s2721_s22 + $0x8] sm:$0xff]   ;;  %v2489_v5 = vld [vmem:[%s2726_s25 + $0x10] sm:$0xff]  }
 0x51c   : > { %v1610_v14 = vrot.slane %v1609_v0, 2  ;;  %v1614_v10 = vsel %vm666_vm2, %v1576_v7, 0.0  ;;  %v1663_v21 = vunpack.c.l.b16 %v1638_v8  ;;  %v2492_v7 = vld [vmem:[%s2726_s25 + $0x28] sm:$0xff]  }
 0x51d   : > { %v1661_v15 = vunpack.c.l.b16 %v1636_v9  ;;  %v1625_v16 = vadd.f32 %v1624_v11, %v1623_v61  ;;  %v1631_v17 = vrot.slane %v1630_v12, 2  ;;  %v1615_v18 = vrot.slane %v1614_v10, 4  ;;  %v2488_v61 = vld [vmem:[%s2726_s25 + $0x8] sm:$0xff]  }
 0x51e   : > { %v1611_v20 = vadd.f32 %v1610_v14, %v1609_v0  ;;  %v2491_v0 = vld [vmem:[%s2726_s25 + $0x20] sm:$0xff]  }
 0x51f   : > { %v1669_v22 = vsel %vm1668_vm5, %v1661_v15, %v1660_v13  ;;  %v1632_v23 = vadd.f32 %v1631_v17, %v1630_v12  ;;  %v1616_v24 = vadd.f32 %v1615_v18, %v1614_v10  ;;  %v1626_v27 = vrot.slane %v1625_v16, 1  ;;  %v2238_v13 = vld [vmem:[%s2731_s28 + $0x8] ss:$0 sm:$0xff]  ;;  %v2239_v10 = vld [vmem:[%s2731_s28 + $0x9] ss:$0 sm:$0xff]  ;;  %v2493_v18 = vld [vmem:[%s2726_s25 + $0x30] sm:$0xff]  }
 0x520   : > { %v1671_v25 = vsel %vm1670_vm6, %v1662_v19, %v1669_v22  ;;  %v1612_v26 = vrot.slane %v1611_v20, 1  ;;  %v2494_v19 = vld [vmem:[%s2726_s25 + $0x38] sm:$0xff]  }
 0x521   : > { %v1673_v28 = vsel %vm1672_vm7, %v1663_v21, %v1671_v25  ;;  %v1633_v30 = vrot.slane %v1632_v23, 1  ;;  %v1617_v29 = vrot.slane %v1616_v24, 2  ;;  %v1627_v34 = vadd.f32 %v1626_v27, %v1625_v16 }
 0x522   : > { %v1613_v31 = vadd.f32 %v1612_v26, %v1611_v20  ;;  %v2240_v20 = vld [vmem:[%s628_s5] ss:$0 sm:$0xff] }
 0x523   : > { %v1618_v33 = vadd.f32 %v1617_v29, %v1616_v24  ;;  %v1634_v35 = vadd.f32 %v1633_v30, %v1632_v23  ;;  %v1641_v40 = vpack.c.bf16 %v1627_v34, %v1627_v34 }
 0x524   : > { %v1639_v32 = vpack.c.bf16 %v1613_v31, %v1613_v31 }
 0x525   : > { %v1619_v36 = vrot.slane %v1618_v33, 1  ;;  %v1642_v44 = vpack.c.bf16 %v1634_v35, %v1634_v35  ;;  %v1666_v48 = vunpack.c.l.b16 %v1641_v40 }
 0x526   : > { %v1664_v38 = vunpack.c.l.b16 %v1639_v32 }
 0x527   : > { %v1620_v39 = vadd.f32 %v1619_v36, %v1618_v33  ;;  %v1667_v51 = vunpack.c.l.b16 %v1642_v44 }
 0x528   : > { %v1675_v41 = vsel %vm1674_vm8, %v1664_v38, %v1673_v28  ;;  %v2244_v28 = vld [vmem:[%s2731_s28 + $0x5] ss:$0 sm:$0xff] }
 0x529   : > { %v1640_v45 = vpack.c.bf16 %v1620_v39, %v1620_v39 }
 0x52b   : > { %v1665_v47 = vunpack.c.l.b16 %v1640_v45 }
 0x52d   : > { %v1677_v52 = vsel %vm1676_vm9, %v1665_v47, %v1675_v41 }
 0x52e   : > { %v1679_v53 = vsel %vm1678_vm10, %v1666_v48, %v1677_v52  ;;  %v2253_v48 = vld [vmem:[%s2731_s28 + $0xa] ss:$0 sm:$0xff]  ;;  %v2254_v52 = vld [vmem:[%s2731_s28 + $0xb] ss:$0 sm:$0xff] }
 0x52f   : > { %v1681_v54 = vsel %vm1680_vm11, %v1667_v51, %v1679_v53 }
 0x530   : > { %v1682_v55 = vpack.c.b16 %v1681_v54, %v1681_v54 }
 0x532   : > { %2382 = vmatmul.mubr.msk.bf16.vlgmr.msra.gmra.mrb[16].mxu1 %vm666_vm2, %v1682_v55  ;;  %v2256_v55 = vld [vmem:[%s2948_s4] ss:$0 sm:$0xff] (!%p2255_p6) }
 0x533   : > { %2389 = vmatprep.mubr.msk.bf16.mxu1 %vm2589_vm1, %v2588_v3  ;;  %2386 = vmatpush3.bf16.msra.mxu1 %v2485_v49 }
 0x534   : > { %2387 = vmatprep.subr.bf16.mxu1 %v2588_v3 }
 0x537   : > { %2388 = vmatpush3.bf16.msra.mxu1 %v2486_v4 }
 0x605   : > { %v1732_v56 = vpop.f32.mrb[16].mxu1 }
 0x606   : > { %v1733_v57 = vadd.f32 %v2234_v50, %v1732_v56  ;;  %v2383_v58 = vpop.f32.mrb[17].mxu1 }
 0x607   : > { %v1735_v59 = vpop.f32.mrb[18].mxu1  ;;  %v2257_v58 = vld [vmem:[#allocation3] ss:$0 sm:$0xff] (!%p2255_p6) }
 0x608   : > { %v2384_v60 = vpop.f32.mrb[19].mxu1  ;;  %v1738_v62 = vadd.f32 %v1733_v57, %v2776_v37  ;;  %v2487_v37 = vld [vmem:[%s2726_s25] sm:$0xff]   ;;  %v2593_v57 = vmov (!%p2255_p6), 0  }
 0x609   : > { %2394 = vmatpush3.bf16.msra.mxu0 %v2487_v37  ;;  %2533 = vset.pattern.permute.xlu0 (!%p2255_p6), %v2593_v57 }
 0x60a   : > { %v1741_v42 = vsel %vm666_vm2, %v1738_v62, 0.0  ;;  %2395 = vmatprep.subr.bf16.mxu0 %v2588_v3 }
 0x60b   : > { %1742 = vadd.xlane.f32.xlu1 %v1741_v42 }
 0x60d   : > { %2396 = vmatpush3.bf16.msra.mxu0 %v2488_v61 }
 0x60e   : > { %2397 = vmatprep.subr.bf16.mxu0 %v2588_v3 }
 0x611   : > { %2398 = vmatpush3.bf16.msra.mxu0 %v2489_v5 }
 0x612   : > { %2399 = vmatprep.subr.bf16.mxu0 %v2588_v3 }
 0x615   : > { %2400 = vmatpush3.bf16.msra.mxu0 %v2490_v6 }
 0x616   : > { %2401 = vmatprep.subr.bf16.mxu0 %v2588_v3 }
 0x619   : > { %2402 = vmatpush3.bf16.msra.mxu0 %v2491_v0 }
 0x61a   : > { %2403 = vmatprep.subr.bf16.mxu0 %v2588_v3 }
 0x61d   : > { %2404 = vmatpush3.bf16.msra.mxu0 %v2492_v7 }
 0x61e   : > { %2405 = vmatprep.subr.bf16.mxu0 %v2588_v3 }
 0x621   : > { %2406 = vmatpush3.bf16.msra.mxu0 %v2493_v18 }
 0x622   : > { %2407 = vmatprep.subr.bf16.mxu0 %v2588_v3 }
 0x625   : > { %2408 = vmatpush3.bf16.msra.mxu0 %v2494_v19 }
 0x698   : > { %v1743_v63 = vpop.xlane.xlu1 %1742 }
 0x699   : > { %v1744_v46 = vmul.f32 0.03125, %v1743_v63 }
 0x69b   : > { %v1745_v1 = vsub.f32 %v1738_v62, %v1744_v46 }
 0x69d   : > { %v1746_v43 = vmul.f32 %v1745_v1, %v1745_v1 }
 0x69f   : > { %v1747_v2 = vsel %vm666_vm2, %v1746_v43, 0.0 }
 0x6a0   : > { %1748 = vadd.xlane.f32.xlu0 %v1747_v2 }
 0x72d   : > { %v1749_v8 = vpop.xlane.xlu0 %1748 }
 0x72e   : > { %v1750_v9 = vmul.f32 0.03125, %v1749_v8 }
 0x730   : > { %v1751_v11 = vadd.f32 1e-05, %v1750_v9 }
 0x732   : > { %2529 = vrsqrt.f32 %v1751_v11 }
 0x73c   : > { %v2530_v12 = vpop.eup %2529 }
 0x73d   : > { %v1753_v14 = vmul.f32 %v2530_v12, %v1745_v1 }
 0x73f   : > { %v1758_v15 = vmul.f32 %v2238_v13, %v1753_v14 }
 0x741   : > { %v1763_v16 = vadd.f32 %v2239_v10, %v1758_v15 }
 0x743   : > { %v1764_v17 = vpack.c.bf16 %v1763_v16, %v1763_v16 }
 0x745   : > { %2390 = vmatmul.mubr.msk.bf16.vlgmr.msra.gmra.mrb[20].mxu1 %vm666_vm2, %v1764_v17 }
 0x818   : > { %v1825_v21 = vpop.f32.mrb[20].mxu1 }
 0x819   : > { %v1826_v22 = vadd.f32 %v2240_v20, %v1825_v21  ;;  %v2391_v23 = vpop.f32.mrb[21].mxu1 }
 0x81a   : > { %v1828_v24 = vpop.f32.mrb[22].mxu1 }
 0x81b   : > { %v1831_v25 = vmax.f32 %v1826_v22, 0.0  ;;  %v2392_v27 = vpop.f32.mrb[23].mxu1 }
 0x81d   : > { %v1832_v26 = vpack.c.bf16 %v1831_v25, %v1831_v25 }
 0x81f   : > { %2410 = vmatmul.mubr.bf16.vlgmr.msra.gmra.mrb[16].mxu0 %v1832_v26 }
 0x8f2   : > { %v1936_v30 = vpop.f32.mrb[16].mxu0 }
 0x8f3   : > { %v1937_v29 = vadd.f32 %v2244_v28, %v1936_v30  ;;  %v2411_v31 = vpop.f32.mrb[17].mxu0 }
 0x8f4   : > { %v1939_v3 = vpop.f32.mrb[18].mxu0 }
 0x8f5   : > { %v2412_v33 = vpop.f32.mrb[19].mxu0  ;;  %v1942_v34 = vadd.f32 %v1937_v29, %v1763_v16 }
 0x8f7   : > { %v1945_v32 = vsel %vm666_vm2, %v1942_v34, 0.0 }
 0x8f8   : > { %1946 = vadd.xlane.f32.xlu1 %v1945_v32 }
 0x985   : > { %v1947_v35 = vpop.xlane.xlu1 %1946 }
 0x986   : > { %v1948_v36 = vmul.f32 0.03125, %v1947_v35 }
 0x988   : > { %v1949_v38 = vsub.f32 %v1942_v34, %v1948_v36 }
 0x98a   : > { %v1950_v39 = vmul.f32 %v1949_v38, %v1949_v38 }
 0x98c   : > { %v1951_v40 = vsel %vm666_vm2, %v1950_v39, 0.0 }
 0x98d   : > { %1952 = vadd.xlane.f32.xlu1 %v1951_v40 }
 0xa1a   : > { %v1953_v41 = vpop.xlane.xlu1 %1952 }
 0xa1b   : > { %v1954_v44 = vmul.f32 0.03125, %v1953_v41 }
 0xa1d   : > { %v1955_v45 = vadd.f32 1e-05, %v1954_v44 }
 0xa1f   : > { %2531 = vrsqrt.f32 %v1955_v45 }
 0xa29   : > { %v2532_v47 = vpop.eup %2531 }
 0xa2a   : > { %v1957_v51 = vmul.f32 %v2532_v47, %v1949_v38  ;;  %1972 = sbr.rel (%p2255_p6) target bundleno = 2884 (0xb44), region = 84 }
 0xa2c   : > { %v1962_v53 = vmul.f32 %v2253_v48, %v1957_v51 }
 0xa2e   : > { %v1967_v54 = vadd.f32 %v2254_v52, %v1962_v53 }
 0xa30   : > { %1968 = vst.msk [vmem:[#allocation2] sm:$0xff] %vm666_vm2, %v1967_v54  ;;  %v1980_v50 = vmul.f32 (!%p2255_p6), %v2256_v55, %v1967_v54 }
 0xa32   : > { %v1981_v56 = vsel %vm666_vm2, %v1980_v50, 0.0 }
 0xa33   : > { %1982 = vadd.xlane.f32.xlu0 %v1981_v56 }
 0xac0   : > { %v1983_v59 = vpop.xlane.xlu0 %1982 }
 0xac1   : > { %v1991_v60 = vadd.f32 %v2257_v58, %v1983_v59 }
 0xac3   : > { %1994 = vperm.xlu0 %2533, %v1991_v60  }
 0xb42   : > { %v1995_v62 = vpop.permute.xlu0 %1994 }
 0xb43   : > { %1997 = vst [vmem:[#allocation4] sm:$0xff] %v1995_v62 }
 0xb44 PF: > { %s2972_s28 = sld [smem:[#allocation8_spill]]  ;;  %s2594_s8 = smov [#allocation4]  }
 0xb45   : > { %s2007_s18 = sshll.u32 %s2594_s8, 4  ;;  %s2008_s18 = int_to_ptr.vmem [resolvable:$true] %s2007_s18 }
 0xb46   : > { %s2534_s20 = scalar_lea.vmem %s2008_s18, 128  ;;  %p2541_p11 = scmp.lt.s32.totalorder %s2008_s18, %s2008_s18 }
 0xb47   : > { %p2535_p8 = scmp.ne.s32.totalorder %s2008_s18, %s2534_s20  ;;  %p2542_p12 = scmp.lt.s32.totalorder %s2534_s20, %s2534_s20 }
 0xb49   : > { %p2543_p13 = por %p2542_p12, %p2541_p11 }
 0xb4a   : > { %s2973_s15 = sadd.s32 4294967295, %s2972_s28  }
 0xb4b   : > { %p2909_p7 = scmp.eq.s32.totalorder %s2973_s15, 1 }
 0xb4d   : > { %p2536_p9 = pnand %p2535_p8, %p2909_p7 }
 0xb4f   : > { %p2537_p10 = pneg %p2536_p9 }
 0xb51   : > { %p2544_p0 = pnand %p2543_p13, %p2537_p10 }
 0xb53   : > { %2547 = shalt.err (!%p2544_p0)
}
 0xb54   : > { %s2975_s27 = sld [smem:[#allocation13_spill]] }
 0xb5a   : > { %s2548_s30 = scalar_lea.hbm %s2975_s27, 128 }
 0xb5b   : > { %p2549_p1 = scmp.ne.s32.totalorder %s2975_s27, %s2548_s30  ;;  %p2554_p4 = scmp.lt.u32.totalorder %s2548_s30, %s2975_s27 }
 0xb5d   : > { %p2550_p2 = pnand %p2549_p1, %p2909_p7 }
 0xb5f   : > { %p2551_p3 = pneg %p2550_p2 }
 0xb61   : > { %p2556_p5 = pnand %p2554_p4, %p2551_p3 }
 0xb63   : > { %2559 = shalt.err (!%p2556_p5)
}
 0xb64   : > { %2415 = dma.vmem_to_hbm [thread:$0]  (%p2909_p7), %s2008_s18, 128, %s2975_s27, [#allocation5]  }
 0xb65   : > { %2573 = dma.done.wait (%p2909_p7), [#allocation5], 128  }
 0xb66   : > { %2575 = vsyncadd (%p2909_p7), [#allocation5], 4294967168 }
 0xb67 PF: > { %s2976_s7 = sld [smem:[#allocation8_spill]]  ;;  %s2977_s15 = sld [smem:[#allocation7_spill]] }
 0xb68   : > { %s2978_s16 = sld [smem:[#allocation9_spill]] }
 0xb6d   : > { %s27_s17 = sadd.s32 1, %s2976_s7  }
 0xb6e   : > { %p24_p6 = scmp.ge.s32.totalorder %s27_s17, 4  }
 0xb70   :  { %26 = sbr.rel (!%p24_p6) target bundleno = 7 (0x7), region = 136 }
 0xb77   :  { %2020 = vsyncpa [#allocation5], 1 }
 0xb78   :  { %2022 = vsyncpa [#allocation5 + $0x1], 1 }

</bundles_post_ra>
